<compile_context>
chip_gen: v7x
topology: tpu7x:2x2x1
jax: 0.10.0
libtpu: 0.0.40
codegen_flags: <defaults>
</compile_context>

<pallas_src>
import jax
import jax.numpy as jnp
from jax import lax
from jax.experimental import pallas as pl
from jax.experimental.pallas import tpu as pltpu

# ---------------------------------------------------------------------------
# Synthetic config for BaseAEModelTorch.  Values chosen so the module's own
# wiring (Flatten -> Linear(in_channels, fc)) is shape-consistent: two valid
# 3x3 convs reduce the 5x5 input patch to 1x1 spatial.
# ---------------------------------------------------------------------------
CONFIG = dict(
    num_channels=4,
    encoder_conv_layers=[8, 16],
    encoder_conv_kernel_size=[3, 3],
    encoder_fc_layers=[32, 32],
    latent_dim=16,
    num_neighbors=0,
    num_conditions=0,          # -> not conditional, hence not adversarial
    adversarial_layers=None,
)
INPUT_HW = 5                   # 5x5 -> (3x3 conv) -> 3x3 -> (3x3 conv) -> 1x1
LANE = 128                     # TPU lane width
ROW_TILE = 256                 # batch-tile rows (multiple of 8)


def _round_up(n, m):
    return (n + m - 1) // m * m


# ---------------------------------------------------------------------------
# Fused encoder kernel:  conv1+ReLU -> conv2+ReLU -> FC+ReLU x2 -> Linear
# All contractions hit the MXU with f32 accumulation; bias+ReLU on the VPU.
# ---------------------------------------------------------------------------
def _encoder_kernel(x_ref,
                    w1_ref, b1_ref,
                    w2_ref, b2_ref,
                    wf1_ref, bf1_ref,
                    wf2_ref, bf2_ref,
                    wlat_ref, blat_ref,
                    o_ref):
    h = jnp.dot(x_ref[...], w1_ref[...], preferred_element_type=jnp.float32)
    h = jnp.maximum(h + b1_ref[...], 0.0)      # conv1 + ReLU (im2col folded)
    h = jnp.dot(h, w2_ref[...], preferred_element_type=jnp.float32)
    h = jnp.maximum(h + b2_ref[...], 0.0)      # conv2 + ReLU (Flatten implicit)
    h = jnp.dot(h, wf1_ref[...], preferred_element_type=jnp.float32)
    h = jnp.maximum(h + bf1_ref[...], 0.0)     # Linear + ReLU
    h = jnp.dot(h, wf2_ref[...], preferred_element_type=jnp.float32)
    h = jnp.maximum(h + bf2_ref[...], 0.0)     # Linear + ReLU
    h = jnp.dot(h, wlat_ref[...], preferred_element_type=jnp.float32)
    o_ref[...] = h + blat_ref[...]             # Linear(latent), lane-dense 128


def _encoder_pallas(x_flat_padded, p, row_tile):
    rows, feat = x_flat_padded.shape
    n_tiles = rows // row_tile

    weights = (p["W1_eff"], p["b1_row"],
               p["W2_mat"], p["b2_row"],
               p["Wf1_mat"], p["bf1_row"],
               p["Wf2_mat"], p["bf2_row"],
               p["Wlat_mat"], p["blat_row"])

    x_spec = pl.BlockSpec((row_tile, feat), lambda i: (i, 0))
    # Weights / biases: constant block index -> stay VMEM-resident across grid.
    w_specs = [pl.BlockSpec(tuple(w.shape), lambda i: (0, 0)) for w in weights]
    out_spec = pl.BlockSpec((row_tile, LANE), lambda i: (i, 0))

    wmats = (p["W1_eff"], p["W2_mat"], p["Wf1_mat"], p["Wf2_mat"], p["Wlat_mat"])
    flops = 2 * rows * sum(int(w.shape[0]) * int(w.shape[1]) for w in wmats)
    bytes_accessed = 4 * (x_flat_padded.size + rows * LANE
                          + sum(int(w.size) for w in weights))

    return pl.pallas_call(
        _encoder_kernel,
        out_shape=jax.ShapeDtypeStruct((rows, LANE), jnp.float32),
        grid=(n_tiles,),
        in_specs=[x_spec] + w_specs,
        out_specs=out_spec,
        compiler_params=pltpu.CompilerParams(
            dimension_semantics=("parallel",)),
        cost_estimate=pl.CostEstimate(
            flops=flops, transcendentals=0, bytes_accessed=bytes_accessed),
    )(x_flat_padded, *weights)


@jax.jit
def base_ae_forward(x, p):
    """Pallas implementation of BaseAEModelTorch.forward (encoder only)."""
    B = x.shape[0]
    in_feat = CONFIG["num_channels"] * INPUT_HW * INPUT_HW
    latent = CONFIG["latent_dim"]

    row_tile = min(ROW_TILE, max(8, _round_up(B, 8)))
    rows = _round_up(B, row_tile)
    feat_pad = _round_up(in_feat, LANE)

    x_flat = x.reshape(B, in_feat)                              # NCHW flatten
    x_pad = jnp.pad(x_flat, ((0, rows - B), (0, feat_pad - in_feat)))

    out = _encoder_pallas(x_pad, p, row_tile)                   # (rows, 128)
    # TODO(synk): adversarial head / GradReverseTorch skipped — default config
    # is non-adversarial and GradReverse is identity in forward anyway.
    return out[:B, :latent]


# ---------------------------------------------------------------------------
# Parameters: raw PyTorch-convention tensors + kernel-form matrices.
# ---------------------------------------------------------------------------
def init_params(key):
    C_in = CONFIG["num_channels"]
    C1, C2 = CONFIG["encoder_conv_layers"]
    F1, F2 = CONFIG["encoder_fc_layers"]
    latent = CONFIG["latent_dim"]
    H = W = INPUT_HW
    OH = OW = INPUT_HW - 2            # valid 3x3 conv

    ks = jax.random.split(key, 10)
    scale = 0.1
    p = {}
    # PyTorch-convention raw shapes (used by the reference)
    p["W1"] = scale * jax.random.normal(ks[0], (C1, C_in, 3, 3), jnp.float32)
    p["b1"] = scale * jax.random.normal(ks[1], (C1,), jnp.float32)
    p["W2"] = scale * jax.random.normal(ks[2], (C2, C1, 3, 3), jnp.float32)
    p["b2"] = scale * jax.random.normal(ks[3], (C2,), jnp.float32)
    p["Wf1"] = scale * jax.random.normal(ks[4], (F1, C2), jnp.float32)  # (out,in)
    p["bf1"] = scale * jax.random.normal(ks[5], (F1,), jnp.float32)
    p["Wf2"] = scale * jax.random.normal(ks[6], (F2, F1), jnp.float32)
    p["bf2"] = scale * jax.random.normal(ks[7], (F2,), jnp.float32)
    p["Wlat"] = scale * jax.random.normal(ks[8], (latent, F2), jnp.float32)
    p["blat"] = scale * jax.random.normal(ks[9], (latent,), jnp.float32)

    # ---- kernel-form matrices -------------------------------------------
    # conv1 folded into one dense matrix: x_flat (ci,h,w) -> h1 (i,j,c1).
    w1_t = jnp.transpose(p["W1"], (1, 2, 3, 0))          # (C_in, 3, 3, C1)
    acc = jnp.zeros((C_in, H, W, OH, OW, C1), jnp.float32)
    for i in range(OH):
        for j in range(OW):
            acc = acc.at[:, i:i + 3, j:j + 3, i, j, :].add(w1_t)
    W1_eff = acc.reshape(C_in * H * W, OH * OW * C1)     # (100, 72)
    in_feat = C_in * H * W
    feat_pad = _round_up(in_feat, LANE)
    p["W1_eff"] = jnp.pad(W1_eff, ((0, feat_pad - in_feat), (0, 0)))  # (128, 72)
    p["b1_row"] = jnp.tile(p["b1"], OH * OW).reshape(1, OH * OW * C1)

    # conv2: rows ordered (di, dj, c1) == h1 feature order (i, j, c1)
    p["W2_mat"] = jnp.transpose(p["W2"], (2, 3, 1, 0)).reshape(9 * C1, C2)
    p["b2_row"] = p["b2"].reshape(1, C2)

    p["Wf1_mat"] = p["Wf1"].T
    p["bf1_row"] = p["bf1"].reshape(1, F1)
    p["Wf2_mat"] = p["Wf2"].T
    p["bf2_row"] = p["bf2"].reshape(1, F2)

    # latent weight/bias zero-padded to 128 output lanes (lane-dense stores)
    p["Wlat_mat"] = jnp.pad(p["Wlat"].T, ((0, 0), (0, LANE - latent)))
    p["blat_row"] = jnp.pad(p["blat"].reshape(1, latent),
                            ((0, 0), (0, LANE - latent)))
    return p


# ---------------------------------------------------------------------------
# Plain-JAX reference replicating the PyTorch nn.Sequential encoder.
# ---------------------------------------------------------------------------
def reference_forward(x, p):
    dn = ("NCHW", "OIHW", "NCHW")
    h = lax.conv_general_dilated(x, p["W1"], (1, 1), "VALID",
                                 dimension_numbers=dn)
    h = jnp.maximum(h + p["b1"][None, :, None, None], 0.0)
    h = lax.conv_general_dilated(h, p["W2"], (1, 1), "VALID",
                                 dimension_numbers=dn)
    h = jnp.maximum(h + p["b2"][None, :, None, None], 0.0)
    h = h.reshape(h.shape[0], -1)                      # nn.Flatten
    h = jnp.maximum(h @ p["Wf1"].T + p["bf1"], 0.0)    # Linear + ReLU
    h = jnp.maximum(h @ p["Wf2"].T + p["bf2"], 0.0)    # Linear + ReLU
    return h @ p["Wlat"].T + p["blat"]                 # Linear(latent_dim)


if __name__ == "__main__":
    key = jax.random.PRNGKey(0)
    kx, kp = jax.random.split(key)
    B = 512   # two 256-row batch tiles -> exercises the parallel grid
    x = jax.random.normal(
        kx, (B, CONFIG["num_channels"], INPUT_HW, INPUT_HW), jnp.float32)
    params = init_params(kp)

    out = jax.block_until_ready(base_ae_forward(x, params))
    ref = jax.block_until_ready(reference_forward(x, params))

    assert out.shape == (B, CONFIG["latent_dim"]), out.shape
    err = float(jnp.max(jnp.abs(out - ref)))
    # Tolerance bounded by the MXU's default f32 matmul precision (bf16-pass
    # products, f32 accumulation) and differing summation order vs. the conv
    # reference.
    if err > 1e-3:
        raise AssertionError(f"Pallas output mismatch vs reference: {err}")
    print("KERNEL_OK")
</pallas_src>

<mosaic_0001>
module attributes {stable_mosaic.version = 11 : i64} {
  func.func @_encoder_kernel(%arg0: i32, %arg1: memref<256x128xf32, #tpu.memory_space<vmem>>, %arg2: memref<128x72xf32, #tpu.memory_space<vmem>>, %arg3: memref<1x72xf32, #tpu.memory_space<vmem>>, %arg4: memref<72x16xf32, #tpu.memory_space<vmem>>, %arg5: memref<1x16xf32, #tpu.memory_space<vmem>>, %arg6: memref<16x32xf32, #tpu.memory_space<vmem>>, %arg7: memref<1x32xf32, #tpu.memory_space<vmem>>, %arg8: memref<32x32xf32, #tpu.memory_space<vmem>>, %arg9: memref<1x32xf32, #tpu.memory_space<vmem>>, %arg10: memref<32x128xf32, #tpu.memory_space<vmem>>, %arg11: memref<1x128xf32, #tpu.memory_space<vmem>>, %arg12: memref<256x128xf32, #tpu.memory_space<vmem>>) attributes {dimension_semantics = [#tpu.dimension_semantics<parallel>], iteration_bounds = array<i64: 2>, scalar_prefetch = 0 : i64, scratch_operands = 0 : i64, tpu.core_type = #tpu.core_type<tc>, window_params = [{transform_indices = @transform_0, window_bounds = array<i64: 256, 128>}, {pipeline_mode = #tpu.pipeline_mode<synchronous>, transform_indices = @transform_1, window_bounds = array<i64: 128, 72>}, {pipeline_mode = #tpu.pipeline_mode<synchronous>, transform_indices = @transform_2, window_bounds = array<i64: 1, 72>}, {pipeline_mode = #tpu.pipeline_mode<synchronous>, transform_indices = @transform_3, window_bounds = array<i64: 72, 16>}, {pipeline_mode = #tpu.pipeline_mode<synchronous>, transform_indices = @transform_4, window_bounds = array<i64: 1, 16>}, {pipeline_mode = #tpu.pipeline_mode<synchronous>, transform_indices = @transform_5, window_bounds = array<i64: 16, 32>}, {pipeline_mode = #tpu.pipeline_mode<synchronous>, transform_indices = @transform_6, window_bounds = array<i64: 1, 32>}, {pipeline_mode = #tpu.pipeline_mode<synchronous>, transform_indices = @transform_7, window_bounds = array<i64: 32, 32>}, {pipeline_mode = #tpu.pipeline_mode<synchronous>, transform_indices = @transform_8, window_bounds = array<i64: 1, 32>}, {pipeline_mode = #tpu.pipeline_mode<synchronous>, transform_indices = @transform_9, window_bounds = array<i64: 32, 128>}, {pipeline_mode = #tpu.pipeline_mode<synchronous>, transform_indices = @transform_10, window_bounds = array<i64: 1, 128>}, {transform_indices = @transform_11, window_bounds = array<i64: 256, 128>}]} {
    %c0 = arith.constant 0 : index
    %c0_0 = arith.constant 0 : index
    %0 = vector.load %arg1[%c0, %c0_0] : memref<256x128xf32, #tpu.memory_space<vmem>>, vector<256x128xf32>
    %c0_1 = arith.constant 0 : index
    %c0_2 = arith.constant 0 : index
    %1 = vector.load %arg2[%c0_1, %c0_2] : memref<128x72xf32, #tpu.memory_space<vmem>>, vector<128x72xf32>
    %cst = arith.constant dense<0.000000e+00> : vector<256x72xf32>
    %2 = tpu.matmul %0, %1, %cst {dimension_numbers = #tpu.dot_dimension_numbers<[1], [0], [0], [1], [0, 0, 1, 1], [], []>} : vector<256x128xf32>, vector<128x72xf32>, vector<256x72xf32> -> vector<256x72xf32>
    %c0_3 = arith.constant 0 : index
    %c0_4 = arith.constant 0 : index
    %3 = vector.load %arg3[%c0_3, %c0_4] : memref<1x72xf32, #tpu.memory_space<vmem>>, vector<1x72xf32>
    %4 = vector.broadcast %3 : vector<1x72xf32> to vector<256x72xf32>
    %5 = arith.addf %2, %4 : vector<256x72xf32>
    %cst_5 = arith.constant 0.000000e+00 : f32
    %6 = vector.broadcast %cst_5 : f32 to vector<256x72xf32>
    %7 = arith.maximumf %5, %6 : vector<256x72xf32>
    %c0_6 = arith.constant 0 : index
    %c0_7 = arith.constant 0 : index
    %8 = vector.load %arg4[%c0_6, %c0_7] : memref<72x16xf32, #tpu.memory_space<vmem>>, vector<72x16xf32>
    %cst_8 = arith.constant dense<0.000000e+00> : vector<256x16xf32>
    %9 = tpu.matmul %7, %8, %cst_8 {dimension_numbers = #tpu.dot_dimension_numbers<[1], [0], [0], [1], [0, 0, 1, 1], [], []>} : vector<256x72xf32>, vector<72x16xf32>, vector<256x16xf32> -> vector<256x16xf32>
    %c0_9 = arith.constant 0 : index
    %c0_10 = arith.constant 0 : index
    %10 = vector.load %arg5[%c0_9, %c0_10] : memref<1x16xf32, #tpu.memory_space<vmem>>, vector<1x16xf32>
    %11 = vector.broadcast %10 : vector<1x16xf32> to vector<256x16xf32>
    %12 = arith.addf %9, %11 : vector<256x16xf32>
    %cst_11 = arith.constant 0.000000e+00 : f32
    %13 = vector.broadcast %cst_11 : f32 to vector<256x16xf32>
    %14 = arith.maximumf %12, %13 : vector<256x16xf32>
    %c0_12 = arith.constant 0 : index
    %c0_13 = arith.constant 0 : index
    %15 = vector.load %arg6[%c0_12, %c0_13] : memref<16x32xf32, #tpu.memory_space<vmem>>, vector<16x32xf32>
    %cst_14 = arith.constant dense<0.000000e+00> : vector<256x32xf32>
    %16 = tpu.matmul %14, %15, %cst_14 {dimension_numbers = #tpu.dot_dimension_numbers<[1], [0], [0], [1], [0, 0, 1, 1], [], []>} : vector<256x16xf32>, vector<16x32xf32>, vector<256x32xf32> -> vector<256x32xf32>
    %c0_15 = arith.constant 0 : index
    %c0_16 = arith.constant 0 : index
    %17 = vector.load %arg7[%c0_15, %c0_16] : memref<1x32xf32, #tpu.memory_space<vmem>>, vector<1x32xf32>
    %18 = vector.broadcast %17 : vector<1x32xf32> to vector<256x32xf32>
    %19 = arith.addf %16, %18 : vector<256x32xf32>
    %cst_17 = arith.constant 0.000000e+00 : f32
    %20 = vector.broadcast %cst_17 : f32 to vector<256x32xf32>
    %21 = arith.maximumf %19, %20 : vector<256x32xf32>
    %c0_18 = arith.constant 0 : index
    %c0_19 = arith.constant 0 : index
    %22 = vector.load %arg8[%c0_18, %c0_19] : memref<32x32xf32, #tpu.memory_space<vmem>>, vector<32x32xf32>
    %cst_20 = arith.constant dense<0.000000e+00> : vector<256x32xf32>
    %23 = tpu.matmul %21, %22, %cst_20 {dimension_numbers = #tpu.dot_dimension_numbers<[1], [0], [0], [1], [0, 0, 1, 1], [], []>} : vector<256x32xf32>, vector<32x32xf32>, vector<256x32xf32> -> vector<256x32xf32>
    %c0_21 = arith.constant 0 : index
    %c0_22 = arith.constant 0 : index
    %24 = vector.load %arg9[%c0_21, %c0_22] : memref<1x32xf32, #tpu.memory_space<vmem>>, vector<1x32xf32>
    %25 = vector.broadcast %24 : vector<1x32xf32> to vector<256x32xf32>
    %26 = arith.addf %23, %25 : vector<256x32xf32>
    %cst_23 = arith.constant 0.000000e+00 : f32
    %27 = vector.broadcast %cst_23 : f32 to vector<256x32xf32>
    %28 = arith.maximumf %26, %27 : vector<256x32xf32>
    %c0_24 = arith.constant 0 : index
    %c0_25 = arith.constant 0 : index
    %29 = vector.load %arg10[%c0_24, %c0_25] : memref<32x128xf32, #tpu.memory_space<vmem>>, vector<32x128xf32>
    %cst_26 = arith.constant dense<0.000000e+00> : vector<256x128xf32>
    %30 = tpu.matmul %28, %29, %cst_26 {dimension_numbers = #tpu.dot_dimension_numbers<[1], [0], [0], [1], [0, 0, 1, 1], [], []>} : vector<256x32xf32>, vector<32x128xf32>, vector<256x128xf32> -> vector<256x128xf32>
    %c0_27 = arith.constant 0 : index
    %c0_28 = arith.constant 0 : index
    %31 = vector.load %arg11[%c0_27, %c0_28] : memref<1x128xf32, #tpu.memory_space<vmem>>, vector<1x128xf32>
    %32 = vector.broadcast %31 : vector<1x128xf32> to vector<256x128xf32>
    %33 = arith.addf %30, %32 : vector<256x128xf32>
    %c0_29 = arith.constant 0 : index
    %c0_30 = arith.constant 0 : index
    %34 = vector.load %arg12[%c0_29, %c0_30] : memref<256x128xf32, #tpu.memory_space<vmem>>, vector<256x128xf32>
    tpu.vector_store %arg12[%c0_29, %c0_30], %33 {strides = array<i32>} : memref<256x128xf32, #tpu.memory_space<vmem>>, vector<256x128xf32>,
    return
  }
  func.func @transform_0(%arg0: i32) -> (i32, i32) {
    %c0_i32 = arith.constant 0 : i32
    %c0_i32_0 = arith.constant 0 : i32
    return %arg0, %c0_i32 : i32, i32
  }
  func.func @transform_1(%arg0: i32) -> (i32, i32) {
    %c0_i32 = arith.constant 0 : i32
    %c0_i32_0 = arith.constant 0 : i32
    %c0_i32_1 = arith.constant 0 : i32
    return %c0_i32, %c0_i32_0 : i32, i32
  }
  func.func @transform_2(%arg0: i32) -> (i32, i32) {
    %c0_i32 = arith.constant 0 : i32
    %c0_i32_0 = arith.constant 0 : i32
    %c0_i32_1 = arith.constant 0 : i32
    return %c0_i32, %c0_i32_0 : i32, i32
  }
  func.func @transform_3(%arg0: i32) -> (i32, i32) {
    %c0_i32 = arith.constant 0 : i32
    %c0_i32_0 = arith.constant 0 : i32
    %c0_i32_1 = arith.constant 0 : i32
    return %c0_i32, %c0_i32_0 : i32, i32
  }
  func.func @transform_4(%arg0: i32) -> (i32, i32) {
    %c0_i32 = arith.constant 0 : i32
    %c0_i32_0 = arith.constant 0 : i32
    %c0_i32_1 = arith.constant 0 : i32
    return %c0_i32, %c0_i32_0 : i32, i32
  }
  func.func @transform_5(%arg0: i32) -> (i32, i32) {
    %c0_i32 = arith.constant 0 : i32
    %c0_i32_0 = arith.constant 0 : i32
    %c0_i32_1 = arith.constant 0 : i32
    return %c0_i32, %c0_i32_0 : i32, i32
  }
  func.func @transform_6(%arg0: i32) -> (i32, i32) {
    %c0_i32 = arith.constant 0 : i32
    %c0_i32_0 = arith.constant 0 : i32
    %c0_i32_1 = arith.constant 0 : i32
    return %c0_i32, %c0_i32_0 : i32, i32
  }
  func.func @transform_7(%arg0: i32) -> (i32, i32) {
    %c0_i32 = arith.constant 0 : i32
    %c0_i32_0 = arith.constant 0 : i32
    %c0_i32_1 = arith.constant 0 : i32
    return %c0_i32, %c0_i32_0 : i32, i32
  }
  func.func @transform_8(%arg0: i32) -> (i32, i32) {
    %c0_i32 = arith.constant 0 : i32
    %c0_i32_0 = arith.constant 0 : i32
    %c0_i32_1 = arith.constant 0 : i32
    return %c0_i32, %c0_i32_0 : i32, i32
  }
  func.func @transform_9(%arg0: i32) -> (i32, i32) {
    %c0_i32 = arith.constant 0 : i32
    %c0_i32_0 = arith.constant 0 : i32
    %c0_i32_1 = arith.constant 0 : i32
    return %c0_i32, %c0_i32_0 : i32, i32
  }
  func.func @transform_10(%arg0: i32) -> (i32, i32) {
    %c0_i32 = arith.constant 0 : i32
    %c0_i32_0 = arith.constant 0 : i32
    %c0_i32_1 = arith.constant 0 : i32
    return %c0_i32, %c0_i32_0 : i32, i32
  }
  func.func @transform_11(%arg0: i32) -> (i32, i32) {
    %c0_i32 = arith.constant 0 : i32
    %c0_i32_0 = arith.constant 0 : i32
    return %arg0, %c0_i32 : i32, i32
  }
}

</mosaic_0001>

<bundles_post_ra>
// kernel: base_ae_forward.1
= control target key start
LH: loop header
LB: loop body
LE: loop exit
PB: predicated region body
PF: predicated region fallthrough
CT: control target
= control target key end

     0   :  { %s3023_s17 = smov 0   ;;  %s3537_s0 = inlined_call_operand.vmem [shape: f32[512,128], index: 0, kind: input, shape index: {}]   ;;  %s3538_s1 = inlined_call_operand.vmem [shape: f32[128,72], index: 1, kind: input, shape index: {}]   ;;  %s3539_s2 = inlined_call_operand.vmem [shape: f32[1,72], index: 2, kind: input, shape index: {}]   ;;  %s3540_s3 = inlined_call_operand.vmem [shape: f32[72,16], index: 3, kind: input, shape index: {}]   ;;  %s3541_s4 = inlined_call_operand.vmem [shape: f32[1,16], index: 4, kind: input, shape index: {}]   ;;  %s3542_s5 = inlined_call_operand.vmem [shape: f32[16,32], index: 5, kind: input, shape index: {}]   ;;  %s3543_s6 = inlined_call_operand.vmem [shape: f32[1,32], index: 6, kind: input, shape index: {}]   ;;  %s3544_s7 = inlined_call_operand.vmem [shape: f32[32,32], index: 7, kind: input, shape index: {}]   ;;  %s3545_s8 = inlined_call_operand.vmem [shape: f32[1,32], index: 8, kind: input, shape index: {}]   ;;  %s3546_s9 = inlined_call_operand.vmem [shape: f32[32,128], index: 9, kind: input, shape index: {}]   ;;  %s3547_s10 = inlined_call_operand.vmem [shape: f32[1,128], index: 10, kind: input, shape index: {}]   ;;  %s3548_s11 = inlined_call_operand.vmem [shape: f32[512,128], index: 11, kind: output, shape index: {}]  }
   0x1 LB: > { %s2220_s18 = sadd.s32 4294967295, %s2961_s17   ;;  %p2224_p0 = scmp.ge.s32.totalorder %s2961_s17, 1  ;;  %s2961_s17 = sphi %s3023_s17, %s21_s17  }
   0x2   : > { %p338_p1 = scmp.lt.s32.totalorder %s2961_s17, 3 }
   0x4   : > { %p339_p2 = pnand %p2224_p0, %p338_p1 }
   0x5   : > { %v422_v0 = vld [vmem:[%s3538_s1] sm:$0xff] (!%p339_p2)  ;;  %v423_v1 = vld [vmem:[%s3538_s1 + $0x8] sm:$0xff] (!%p339_p2)  ;;  %v424_v2 = vld [vmem:[%s3538_s1 + $0x10] sm:$0xff] (!%p339_p2)  ;;  %s2225_s25 = sshll.u32 (!%p339_p2), %s2220_s18, 5  ;;  %vm718_vm0 = vcmask (!%p339_p2), 588800   ;;  %vm1081_vm1 = vcmask (!%p339_p2), 130048  }
   0x6   : > { %342 = sbr.rel (%p339_p2) target bundleno = 1188 (0x4a4), region = 64  ;;  %v2869_v3 = vpack.c.bf16 (!%p339_p2), %v423_v1, %v422_v0  ;;  %v425_v4 = vld [vmem:[%s3538_s1 + $0x18] sm:$0xff] (!%p339_p2)  ;;  %p379_p3 = scmp.lt.s32.totalorder (!%p339_p2), %s2225_s25, 63  ;;  %v426_v6 = vld [vmem:[%s3538_s1 + $0x20] sm:$0xff] (!%p339_p2)  ;;  %v427_v7 = vld [vmem:[%s3538_s1 + $0x28] sm:$0xff] (!%p339_p2)  ;;  %vm1446_vm2 = vcmask (!%p339_p2), 261120  }
   0x7   : > { %v2873_v5 = vpack.c.bf16 (!%p339_p2), %v425_v4, %v424_v2  ;;  %v2877_v8 = vpack.c.bf16 (!%p339_p2), %v427_v7, %v426_v6  ;;  %v428_v9 = vld [vmem:[%s3538_s1 + $0x30] sm:$0xff] (!%p339_p2)  ;;  %v702_v10 = vld [vmem:[%s3540_s3] sm:$0xff] (!%p339_p2)  ;;  %v703_v11 = vld [vmem:[%s3540_s3 + $0x8] sm:$0xff] (!%p339_p2) }
   0x8   : > { %2870 = vmatprep.subr.bf16.mxu0 (!%p339_p2), %v2869_v3  ;;  %v429_v12 = vld [vmem:[%s3538_s1 + $0x38] sm:$0xff] (!%p339_p2)  ;;  %v704_v13 = vld [vmem:[%s3540_s3 + $0x10] sm:$0xff] (!%p339_p2)  ;;  %v2901_v16 = vpack.c.bf16 (!%p339_p2), %v703_v11, %v702_v10  ;;  %v430_v19 = vld [vmem:[%s3538_s1 + $0x40] sm:$0xff] (!%p339_p2) }
   0x9   : > { %2872 = vmatpush3.bf16.msra.mxu0 (!%p339_p2), %v2869_v3  ;;  %v705_v14 = vld [vmem:[%s3540_s3 + $0x18] sm:$0xff] (!%p339_p2)  ;;  %v2881_v17 = vpack.c.bf16 (!%p339_p2), %v429_v12, %v428_v9  ;;  %v431_v20 = vld [vmem:[%s3538_s1 + $0x48] sm:$0xff] (!%p339_p2)  ;;  %v432_v22 = vld [vmem:[%s3538_s1 + $0x50] sm:$0xff] (!%p339_p2) }
   0xa   : > { %2874 = vmatprep.subr.bf16.mxu0 (!%p339_p2), %v2873_v5  ;;  %v2905_v18 = vpack.c.bf16 (!%p339_p2), %v705_v14, %v704_v13  ;;  %2937 = vmatprep.subr.bf16.mxu1 (!%p339_p2), %v2901_v16  ;;  %v2885_v21 = vpack.c.bf16 (!%p339_p2), %v431_v20, %v430_v19  ;;  %v433_v23 = vld [vmem:[%s3538_s1 + $0x58] sm:$0xff] (!%p339_p2)  ;;  %v706_v24 = vld [vmem:[%s3540_s3 + $0x20] sm:$0xff] (!%p339_p2)  ;;  %v707_v27 = vld [vmem:[%s3540_s3 + $0x28] sm:$0xff] (!%p339_p2) }
   0xb   : > { %2942 = vmatpush3.bf16.msra.mxu1 (!%p339_p2), %v2901_v16  ;;  %v2889_v25 = vpack.c.bf16 (!%p339_p2), %v433_v23, %v432_v22  ;;  %v434_v26 = vld [vmem:[%s3538_s1 + $0x60] sm:$0xff] (!%p339_p2)  ;;  %v435_v28 = vld [vmem:[%s3538_s1 + $0x68] sm:$0xff] (!%p339_p2)  ;;  %v2909_v29 = vpack.c.bf16 (!%p339_p2), %v707_v27, %v706_v24  ;;  %v708_v30 = vld [vmem:[%s3540_s3 + $0x30] sm:$0xff] (!%p339_p2) }
   0xc   : > { %2938 = vmatprep.subr.bf16.mxu1 (!%p339_p2), %v2905_v18  ;;  %v709_v31 = vld [vmem:[%s3540_s3 + $0x38] sm:$0xff] (!%p339_p2)  ;;  %v2893_v33 = vpack.c.bf16 (!%p339_p2), %v435_v28, %v434_v26  ;;  %v436_v34 = vld [vmem:[%s3538_s1 + $0x70] sm:$0xff] (!%p339_p2)  ;;  %v710_v37 = vld [vmem:[%s3540_s3 + $0x40] sm:$0xff] (!%p339_p2) }
   0xd   : > { %s3550_s25 = smov (!%p379_p3, %s2225_s25), 63  ;;  %2876 = vmatpush3.bf16.msra.mxu0 %v2873_v5  ;;  %v2913_v32 = vpack.c.bf16 %v709_v31, %v708_v30  ;;  %v437_v35 = vld [vmem:[%s3538_s1 + $0x78] sm:$0xff]  ;;  %v1072_v5 = vld [vmem:[%s3542_s5] sm:$0xff]  ;;  %v1073_v6 = vld [vmem:[%s3542_s5 + $0x8] sm:$0xff] }
   0xe   : > { %s2226_s15 = sshll.u32 %s3550_s25, 3  ;;  %2878 = vmatprep.subr.bf16.mxu0 %v2877_v8  ;;  %v2897_v36 = vpack.c.bf16 %v437_v35, %v436_v34  ;;  %v3154_v7 = vpack.c.bf16 %v1073_v6, %v1072_v5 }
   0xf   : > { %s3069_s26 = scalar_lea.vmem %s3537_s0, %s2226_s15  ;;  %2943 = vmatpush3.bf16.msra.mxu1 %v2905_v18  ;;  %s3468_s27 = scalar_lea.vmem %s3548_s11, %s2226_s15 }
  0x10   : > { %v390_v15 = vld [vmem:[%s3069_s26] sm:$0xff]  ;;  %2939 = vmatprep.subr.bf16.mxu1 %v2909_v29  ;;  %v391_v38 = vld [vmem:[%s3069_s26 + $0x8] sm:$0xff]  ;;  %v392_v39 = vld [vmem:[%s3069_s26 + $0x10] sm:$0xff] }
  0x11   : > { %2591 = vmatprep.mubr.f32.mxu0 %v390_v15  ;;  %2880 = vmatpush3.bf16.msra.mxu0 %v2877_v8  ;;  %v393_v40 = vld [vmem:[%s3069_s26 + $0x18] sm:$0xff]  ;;  %v394_v41 = vld [vmem:[%s3069_s26 + $0x20] sm:$0xff]  ;;  %v395_v42 = vld [vmem:[%s3069_s26 + $0x28] sm:$0xff] }
  0x12   : > { %2882 = vmatprep.subr.bf16.mxu0 %v2881_v17  ;;  %v396_v43 = vld [vmem:[%s3069_s26 + $0x30] sm:$0xff]  ;;  %v397_v44 = vld [vmem:[%s3069_s26 + $0x38] sm:$0xff]  ;;  %v398_v45 = vld [vmem:[%s3069_s26 + $0x40] sm:$0xff] }
  0x13   : > { %2944 = vmatpush3.bf16.msra.mxu1 %v2909_v29  ;;  %v399_v46 = vld [vmem:[%s3069_s26 + $0x48] sm:$0xff]  ;;  %v400_v47 = vld [vmem:[%s3069_s26 + $0x50] sm:$0xff]  ;;  %v401_v48 = vld [vmem:[%s3069_s26 + $0x58] sm:$0xff] }
  0x14   : > { %2940 = vmatprep.subr.bf16.mxu1 %v2913_v32  ;;  %v402_v49 = vld [vmem:[%s3069_s26 + $0x60] sm:$0xff]  ;;  %v403_v50 = vld [vmem:[%s3069_s26 + $0x68] sm:$0xff]  ;;  %v404_v51 = vld [vmem:[%s3069_s26 + $0x70] sm:$0xff] }
  0x15   : > { %2884 = vmatpush3.bf16.msra.mxu0 %v2881_v17  ;;  %v405_v52 = vld [vmem:[%s3069_s26 + $0x78] sm:$0xff]  ;;  %v406_v53 = vld [vmem:[%s3069_s26 + $0x80] sm:$0xff]  ;;  %v407_v54 = vld [vmem:[%s3069_s26 + $0x88] sm:$0xff] }
  0x16   : > { %2886 = vmatprep.subr.bf16.mxu0 %v2885_v21  ;;  %v408_v55 = vld [vmem:[%s3069_s26 + $0x90] sm:$0xff]  ;;  %v409_v56 = vld [vmem:[%s3069_s26 + $0x98] sm:$0xff]  ;;  %v410_v57 = vld [vmem:[%s3069_s26 + $0xa0] sm:$0xff] }
  0x17   : > { %2945 = vmatpush3.bf16.msra.mxu1 %v2913_v32  ;;  %v411_v58 = vld [vmem:[%s3069_s26 + $0xa8] sm:$0xff]  ;;  %v412_v59 = vld [vmem:[%s3069_s26 + $0xb0] sm:$0xff]  ;;  %v413_v60 = vld [vmem:[%s3069_s26 + $0xb8] sm:$0xff] }
  0x18   : > { %2941 = vmatprep.subr.mxu1 %v710_v37  ;;  %v414_v61 = vld [vmem:[%s3069_s26 + $0xc0] sm:$0xff]  ;;  %v415_v62 = vld [vmem:[%s3069_s26 + $0xc8] sm:$0xff]  ;;  %v416_v63 = vld [vmem:[%s3069_s26 + $0xd0] sm:$0xff] }
  0x19   : > { %2888 = vmatpush3.bf16.msra.mxu0 %v2885_v21  ;;  %v417_v0 = vld [vmem:[%s3069_s26 + $0xd8] sm:$0xff]  ;;  %v418_v1 = vld [vmem:[%s3069_s26 + $0xe0] sm:$0xff]  ;;  %v419_v2 = vld [vmem:[%s3069_s26 + $0xe8] sm:$0xff] }
  0x1a   : > { %2890 = vmatprep.subr.bf16.mxu0 %v2889_v25  ;;  %v420_v3 = vld [vmem:[%s3069_s26 + $0xf0] sm:$0xff]  ;;  %v421_v4 = vld [vmem:[%s3069_s26 + $0xf8] sm:$0xff]  ;;  %v3160_v8 = vld [vmem:[%s3539_s2] ss:$0 sm:$0xff] }
  0x1b   : > { %2946 = vmatpush3.msra.mxu1 %v710_v37 }
  0x1c   : > { %2918 = vmatprep.subr.bf16.mxu1 %v3154_v7 }
  0x1d   : > { %2892 = vmatpush3.bf16.msra.mxu0 %v2889_v25 }
  0x1e   : > { %2894 = vmatprep.subr.bf16.mxu0 %v2893_v33 }
  0x21   : > { %2896 = vmatpush3.bf16.msra.mxu0 %v2893_v33 }
  0x22   : > { %2898 = vmatprep.subr.bf16.mxu0 %v2897_v36 }
  0x25   : > { %2900 = vmatpush3.bf16.msra.mxu0 %v2897_v36 }
  0x26   : > { %2902 = vmatprep.subr.bf16.mxu0 %v2901_v16 }
  0x28   : > { %2592 = vmatmul.mubr.f32.vlgmr.msra.gmra.mrb[0].mxu0 %v391_v38 }
  0x29   : > { %2594 = vmatprep.mubr.f32.mxu0 %v392_v39  ;;  %2904 = vmatpush3.bf16.msra.mxu0 %v2901_v16 }
  0x2a   : > { %2906 = vmatprep.subr.bf16.mxu0 %v2905_v18 }
  0x2c   : > { %2595 = vmatmul.mubr.f32.gmra.mrb[2].mxu0 %v393_v40 }
  0x2d   : > { %2597 = vmatprep.mubr.f32.mxu0 %v394_v41  ;;  %2908 = vmatpush3.bf16.msra.mxu0 %v2905_v18 }
  0x2e   : > { %2910 = vmatprep.subr.bf16.mxu0 %v2909_v29 }
  0x30   : > { %2598 = vmatmul.mubr.f32.gmra.mrb[4].mxu0 %v395_v42 }
  0x31   : > { %2600 = vmatprep.mubr.f32.mxu0 %v396_v43  ;;  %2912 = vmatpush3.bf16.msra.mxu0 %v2909_v29 }
  0x32   : > { %2914 = vmatprep.subr.bf16.mxu0 %v2913_v32 }
  0x34   : > { %2601 = vmatmul.mubr.f32.gmra.mrb[6].mxu0 %v397_v44 }
  0x35   : > { %2603 = vmatprep.mubr.f32.mxu0 %v398_v45  ;;  %2916 = vmatpush3.bf16.msra.mxu0 %v2913_v32 }
  0x36   : > { %2655 = vmatprep.subr.mxu0 %v710_v37 }
  0x38   : > { %2604 = vmatmul.mubr.f32.gmra.mrb[8].mxu0 %v399_v46 }
  0x39   : > { %2606 = vmatprep.mubr.f32.mxu0 %v400_v47  ;;  %2656 = vmatpush3.msra.mxu0 %v710_v37 }
  0x3c   : > { %2607 = vmatmul.mubr.f32.gmra.mrb[10].mxu0 %v401_v48 }
  0x3d   : > { %2609 = vmatprep.mubr.f32.mxu0 %v402_v49 }
  0x40   : > { %2610 = vmatmul.mubr.f32.gmra.mrb[12].mxu0 %v403_v50 }
  0x41   : > { %2612 = vmatprep.mubr.f32.mxu0 %v404_v51 }
  0x44   : > { %2613 = vmatmul.mubr.f32.gmra.mrb[14].mxu0 %v405_v52 }
  0x45   : > { %2615 = vmatprep.mubr.f32.mxu0 %v406_v53 }
  0x48   : > { %2616 = vmatmul.mubr.f32.gmra.mrb[16].mxu0 %v407_v54 }
  0x49   : > { %2618 = vmatprep.mubr.f32.mxu0 %v408_v55 }
  0x4c   : > { %2619 = vmatmul.mubr.f32.gmra.mrb[18].mxu0 %v409_v56 }
  0x4d   : > { %2621 = vmatprep.mubr.f32.mxu0 %v410_v57 }
  0x50   : > { %2622 = vmatmul.mubr.f32.gmra.mrb[20].mxu0 %v411_v58 }
  0x51   : > { %2624 = vmatprep.mubr.f32.mxu0 %v412_v59 }
  0x54   : > { %2625 = vmatmul.mubr.f32.gmra.mrb[22].mxu0 %v413_v60 }
  0x55   : > { %2627 = vmatprep.mubr.f32.mxu0 %v414_v61 }
  0x58   : > { %2628 = vmatmul.mubr.f32.gmra.mrb[24].mxu0 %v415_v62 }
  0x59   : > { %2630 = vmatprep.mubr.f32.mxu0 %v416_v63 }
  0x5c   : > { %2631 = vmatmul.mubr.f32.gmra.mrb[26].mxu0 %v417_v0 }
  0x5d   : > { %2633 = vmatprep.mubr.f32.mxu0 %v418_v1 }
  0x60   : > { %2634 = vmatmul.mubr.f32.gmra.mrb[28].mxu0 %v419_v2 }
  0x61   : > { %2636 = vmatprep.mubr.f32.mxu0 %v420_v3 }
  0x64   : > { %2637 = vmatmul.mubr.f32.gmra.mrb[30].mxu0 %v421_v4 }
  0xfb   : > { %v2593_v9 = vpop.f32.mrb[0].mxu0 }
  0xfc   : > { %v517_v10 = vadd.f32 %v2593_v9, %v3160_v8  ;;  %v511_v11 = vpop.f32.mrb[1].mxu0 }
  0xfd   : > { %v512_v12 = vadd.f32 %v3160_v8, %v511_v11 }
  0xfe   : > { %v671_v15 = vmax.f32 %v517_v10, 0.0 }
  0xff   : > { %v670_v13 = vmax.f32 %v512_v12, 0.0  ;;  %v2596_v14 = vpop.f32.mrb[2].mxu0 }
 0x100   : > { %v527_v16 = vadd.f32 %v2596_v14, %v3160_v8  ;;  %v521_v17 = vpop.f32.mrb[3].mxu0 }
 0x101   : > { %v522_v18 = vadd.f32 %v3160_v8, %v521_v17  ;;  %2657 = vmatprep.mubr.msk.f32.mxu0 %vm718_vm0, %v670_v13 }
 0x102   : > { %2658 = vmatmul.mubr.msk.f32.vlgmr.msra.gmra.mrb[32].mxu0 %vm718_vm0, %v671_v15  ;;  %v673_v21 = vmax.f32 %v527_v16, 0.0 }
 0x103   : > { %v672_v19 = vmax.f32 %v522_v18, 0.0  ;;  %v2599_v20 = vpop.f32.mrb[4].mxu0 }
 0x104   : > { %v537_v22 = vadd.f32 %v2599_v20, %v3160_v8  ;;  %v531_v23 = vpop.f32.mrb[5].mxu0 }
 0x105   : > { %v532_v24 = vadd.f32 %v3160_v8, %v531_v23  ;;  %2660 = vmatprep.mubr.msk.f32.mxu0 %vm718_vm0, %v672_v19 }
 0x106   : > { %2661 = vmatmul.mubr.msk.f32.gmra.mrb[34].mxu0 %vm718_vm0, %v673_v21  ;;  %v675_v27 = vmax.f32 %v537_v22, 0.0 }
 0x107   : > { %v674_v25 = vmax.f32 %v532_v24, 0.0  ;;  %v2602_v26 = vpop.f32.mrb[6].mxu0 }
 0x108   : > { %v547_v28 = vadd.f32 %v2602_v26, %v3160_v8  ;;  %v541_v29 = vpop.f32.mrb[7].mxu0 }
 0x109   : > { %v542_v30 = vadd.f32 %v3160_v8, %v541_v29  ;;  %2663 = vmatprep.mubr.msk.f32.mxu0 %vm718_vm0, %v674_v25 }
 0x10a   : > { %2664 = vmatmul.mubr.msk.f32.gmra.mrb[36].mxu0 %vm718_vm0, %v675_v27  ;;  %v677_v33 = vmax.f32 %v547_v28, 0.0 }
 0x10b   : > { %v676_v31 = vmax.f32 %v542_v30, 0.0  ;;  %v2605_v32 = vpop.f32.mrb[8].mxu0 }
 0x10c   : > { %v557_v34 = vadd.f32 %v2605_v32, %v3160_v8  ;;  %v551_v35 = vpop.f32.mrb[9].mxu0 }
 0x10d   : > { %v552_v36 = vadd.f32 %v3160_v8, %v551_v35  ;;  %2666 = vmatprep.mubr.msk.f32.mxu0 %vm718_vm0, %v676_v31 }
 0x10e   : > { %2667 = vmatmul.mubr.msk.f32.gmra.mrb[38].mxu0 %vm718_vm0, %v677_v33  ;;  %v679_v39 = vmax.f32 %v557_v34, 0.0 }
 0x10f   : > { %v678_v37 = vmax.f32 %v552_v36, 0.0  ;;  %v2608_v38 = vpop.f32.mrb[10].mxu0 }
 0x110   : > { %v567_v40 = vadd.f32 %v2608_v38, %v3160_v8  ;;  %v561_v41 = vpop.f32.mrb[11].mxu0 }
 0x111   : > { %v562_v42 = vadd.f32 %v3160_v8, %v561_v41  ;;  %2669 = vmatprep.mubr.msk.f32.mxu0 %vm718_vm0, %v678_v37 }
 0x112   : > { %2670 = vmatmul.mubr.msk.f32.gmra.mrb[40].mxu0 %vm718_vm0, %v679_v39  ;;  %v681_v45 = vmax.f32 %v567_v40, 0.0 }
 0x113   : > { %v680_v43 = vmax.f32 %v562_v42, 0.0  ;;  %v2611_v44 = vpop.f32.mrb[12].mxu0  ;;  %v1435_v42 = vld [vmem:[%s3544_s7] sm:$0xff] }
 0x114   : > { %v577_v46 = vadd.f32 %v2611_v44, %v3160_v8  ;;  %v571_v47 = vpop.f32.mrb[13].mxu0 }
 0x115   : > { %v572_v48 = vadd.f32 %v3160_v8, %v571_v47  ;;  %2672 = vmatprep.mubr.msk.f32.mxu0 %vm718_vm0, %v680_v43  ;;  %v1436_v43 = vld [vmem:[%s3544_s7 + $0x8] sm:$0xff]  ;;  %v3242_v47 = vld [vmem:[%s3541_s4] ss:$0 sm:$0xff] }
 0x116   : > { %2673 = vmatmul.mubr.msk.f32.gmra.mrb[42].mxu0 %vm718_vm0, %v681_v45  ;;  %v683_v51 = vmax.f32 %v577_v46, 0.0  ;;  %v2921_v44 = vpack.c.bf16 %v1436_v43, %v1435_v42  ;;  %v1438_v45 = vld [vmem:[%s3544_s7 + $0x18] sm:$0xff] }
 0x117   : > { %v682_v49 = vmax.f32 %v572_v48, 0.0  ;;  %v2614_v50 = vpop.f32.mrb[14].mxu0 }
 0x118   : > { %v587_v52 = vadd.f32 %v2614_v50, %v3160_v8  ;;  %v581_v53 = vpop.f32.mrb[15].mxu0  ;;  %2922 = vmatprep.subr.bf16.mxu0 %v2921_v44 }
 0x119   : > { %v582_v54 = vadd.f32 %v3160_v8, %v581_v53  ;;  %2675 = vmatprep.mubr.msk.f32.mxu1 %vm718_vm0, %v682_v49  ;;  %2924 = vmatpush3.bf16.msra.mxu0 %v2921_v44 }
 0x11a   : > { %2676 = vmatmul.mubr.msk.f32.vlgmr.msra.gmra.mrb[0].mxu1 %vm718_vm0, %v683_v51  ;;  %v685_v57 = vmax.f32 %v587_v52, 0.0 }
 0x11b   : > { %v684_v55 = vmax.f32 %v582_v54, 0.0  ;;  %v2617_v56 = vpop.f32.mrb[16].mxu0  ;;  %2920 = vmatpush3.bf16.msra.mxu1 %v3154_v7 }
 0x11c   : > { %v597_v58 = vadd.f32 %v2617_v56, %v3160_v8  ;;  %v591_v59 = vpop.f32.mrb[17].mxu0 }
 0x11d   : > { %v592_v60 = vadd.f32 %v3160_v8, %v591_v59  ;;  %2678 = vmatprep.mubr.msk.f32.mxu1 %vm718_vm0, %v684_v55 }
 0x11e   : > { %2679 = vmatmul.mubr.msk.f32.gmra.mrb[2].mxu1 %vm718_vm0, %v685_v57  ;;  %v687_v63 = vmax.f32 %v597_v58, 0.0 }
 0x11f   : > { %v686_v61 = vmax.f32 %v592_v60, 0.0  ;;  %v2620_v62 = vpop.f32.mrb[18].mxu0 }
 0x120   : > { %v607_v0 = vadd.f32 %v2620_v62, %v3160_v8  ;;  %v601_v1 = vpop.f32.mrb[19].mxu0 }
 0x121   : > { %v602_v2 = vadd.f32 %v3160_v8, %v601_v1  ;;  %2681 = vmatprep.mubr.msk.f32.mxu1 %vm718_vm0, %v686_v61 }
 0x122   : > { %2682 = vmatmul.mubr.msk.f32.gmra.mrb[4].mxu1 %vm718_vm0, %v687_v63  ;;  %v689_v5 = vmax.f32 %v607_v0, 0.0 }
 0x123   : > { %v688_v3 = vmax.f32 %v602_v2, 0.0  ;;  %v2623_v4 = vpop.f32.mrb[20].mxu0 }
 0x124   : > { %v617_v6 = vadd.f32 %v2623_v4, %v3160_v8  ;;  %v611_v7 = vpop.f32.mrb[21].mxu0 }
 0x125   : > { %v612_v9 = vadd.f32 %v3160_v8, %v611_v7  ;;  %2684 = vmatprep.mubr.msk.f32.mxu1 %vm718_vm0, %v688_v3 }
 0x126   : > { %2685 = vmatmul.mubr.msk.f32.gmra.mrb[6].mxu1 %vm718_vm0, %v689_v5  ;;  %v691_v12 = vmax.f32 %v617_v6, 0.0 }
 0x127   : > { %v690_v10 = vmax.f32 %v612_v9, 0.0  ;;  %v2626_v11 = vpop.f32.mrb[22].mxu0 }
 0x128   : > { %v627_v13 = vadd.f32 %v2626_v11, %v3160_v8  ;;  %v621_v14 = vpop.f32.mrb[23].mxu0 }
 0x129   : > { %v622_v15 = vadd.f32 %v3160_v8, %v621_v14  ;;  %2687 = vmatprep.mubr.msk.f32.mxu1 %vm718_vm0, %v690_v10 }
 0x12a   : > { %2688 = vmatmul.mubr.msk.f32.gmra.mrb[8].mxu1 %vm718_vm0, %v691_v12  ;;  %v693_v18 = vmax.f32 %v627_v13, 0.0 }
 0x12b   : > { %v692_v16 = vmax.f32 %v622_v15, 0.0  ;;  %v2629_v17 = vpop.f32.mrb[24].mxu0 }
 0x12c   : > { %v637_v19 = vadd.f32 %v2629_v17, %v3160_v8  ;;  %v631_v20 = vpop.f32.mrb[25].mxu0 }
 0x12d   : > { %v632_v21 = vadd.f32 %v3160_v8, %v631_v20  ;;  %2690 = vmatprep.mubr.msk.f32.mxu1 %vm718_vm0, %v692_v16 }
 0x12e   : > { %2691 = vmatmul.mubr.msk.f32.gmra.mrb[10].mxu1 %vm718_vm0, %v693_v18  ;;  %v695_v24 = vmax.f32 %v637_v19, 0.0 }
 0x12f   : > { %v694_v22 = vmax.f32 %v632_v21, 0.0  ;;  %v2632_v23 = vpop.f32.mrb[26].mxu0 }
 0x130   : > { %v647_v25 = vadd.f32 %v2632_v23, %v3160_v8  ;;  %v641_v26 = vpop.f32.mrb[27].mxu0 }
 0x131   : > { %v642_v27 = vadd.f32 %v3160_v8, %v641_v26  ;;  %2693 = vmatprep.mubr.msk.f32.mxu1 %vm718_vm0, %v694_v22 }
 0x132   : > { %2694 = vmatmul.mubr.msk.f32.gmra.mrb[12].mxu1 %vm718_vm0, %v695_v24  ;;  %v697_v30 = vmax.f32 %v647_v25, 0.0 }
 0x133   : > { %v696_v28 = vmax.f32 %v642_v27, 0.0  ;;  %v2635_v29 = vpop.f32.mrb[28].mxu0 }
 0x134   : > { %v657_v31 = vadd.f32 %v2635_v29, %v3160_v8  ;;  %v651_v32 = vpop.f32.mrb[29].mxu0 }
 0x135   : > { %v652_v33 = vadd.f32 %v3160_v8, %v651_v32  ;;  %2696 = vmatprep.mubr.msk.f32.mxu1 %vm718_vm0, %v696_v28 }
 0x136   : > { %2697 = vmatmul.mubr.msk.f32.gmra.mrb[14].mxu1 %vm718_vm0, %v697_v30  ;;  %v699_v36 = vmax.f32 %v657_v31, 0.0 }
 0x137   : > { %v698_v34 = vmax.f32 %v652_v33, 0.0  ;;  %v2638_v35 = vpop.f32.mrb[30].mxu0 }
 0x138   : > { %v667_v37 = vadd.f32 %v2638_v35, %v3160_v8  ;;  %v661_v38 = vpop.f32.mrb[31].mxu0 }
 0x139   : > { %v662_v39 = vadd.f32 %v3160_v8, %v661_v38  ;;  %2699 = vmatprep.mubr.msk.f32.mxu1 %vm718_vm0, %v698_v34  ;;  %v1437_v8 = vld [vmem:[%s3544_s7 + $0x10] sm:$0xff] }
 0x13a   : > { %2700 = vmatmul.mubr.msk.f32.gmra.mrb[16].mxu1 %vm718_vm0, %v699_v36  ;;  %v701_v41 = vmax.f32 %v667_v37, 0.0  ;;  %v2925_v46 = vpack.c.bf16 %v1438_v45, %v1437_v8 }
 0x13b   : > { %v700_v40 = vmax.f32 %v662_v39, 0.0 }
 0x13c   : > { %2926 = vmatprep.subr.bf16.mxu0 %v2925_v46 }
 0x13d   : > { %2702 = vmatprep.mubr.msk.f32.mxu1 %vm718_vm0, %v700_v40  ;;  %2928 = vmatpush3.bf16.msra.mxu0 %v2925_v46 }
 0x13e   : > { %2703 = vmatmul.mubr.msk.f32.gmra.mrb[18].mxu1 %vm718_vm0, %v701_v41 }
 0x1d5   : > { %v2659_v48 = vpop.f32.mrb[32].mxu0 }
 0x1d6   : > { %v887_v49 = vadd.f32 %v2659_v48, %v3242_v47  ;;  %v881_v50 = vpop.f32.mrb[33].mxu0 }
 0x1d7   : > { %v882_v51 = vadd.f32 %v3242_v47, %v881_v50 }
 0x1d8   : > { %v1041_v54 = vmax.f32 %v887_v49, 0.0 }
 0x1d9   : > { %v1040_v52 = vmax.f32 %v882_v51, 0.0  ;;  %v2662_v53 = vpop.f32.mrb[34].mxu0 }
 0x1da   : > { %v897_v55 = vadd.f32 %v2662_v53, %v3242_v47  ;;  %v891_v56 = vpop.f32.mrb[35].mxu0 }
 0x1db   : > { %v892_v57 = vadd.f32 %v3242_v47, %v891_v56  ;;  %2709 = vmatprep.mubr.msk.f32.mxu1 %vm1081_vm1, %v1040_v52 }
 0x1dc   : > { %2710 = vmatmul.mubr.msk.f32.vlgmr.msra.gmra.mrb[20].mxu1 %vm1081_vm1, %v1041_v54  ;;  %v1043_v60 = vmax.f32 %v897_v55, 0.0 }
 0x1dd   : > { %v1042_v58 = vmax.f32 %v892_v57, 0.0  ;;  %v2665_v59 = vpop.f32.mrb[36].mxu0 }
 0x1de   : > { %v907_v61 = vadd.f32 %v2665_v59, %v3242_v47  ;;  %v901_v62 = vpop.f32.mrb[37].mxu0 }
 0x1df   : > { %v902_v63 = vadd.f32 %v3242_v47, %v901_v62  ;;  %2712 = vmatprep.mubr.msk.f32.mxu1 %vm1081_vm1, %v1042_v58 }
 0x1e0   : > { %2713 = vmatmul.mubr.msk.f32.gmra.mrb[22].mxu1 %vm1081_vm1, %v1043_v60  ;;  %v1045_v2 = vmax.f32 %v907_v61, 0.0 }
 0x1e1   : > { %v1044_v0 = vmax.f32 %v902_v63, 0.0  ;;  %v2668_v1 = vpop.f32.mrb[38].mxu0 }
 0x1e2   : > { %v917_v3 = vadd.f32 %v2668_v1, %v3242_v47  ;;  %v911_v4 = vpop.f32.mrb[39].mxu0 }
 0x1e3   : > { %v912_v5 = vadd.f32 %v3242_v47, %v911_v4  ;;  %2715 = vmatprep.mubr.msk.f32.mxu1 %vm1081_vm1, %v1044_v0 }
 0x1e4   : > { %2716 = vmatmul.mubr.msk.f32.gmra.mrb[24].mxu1 %vm1081_vm1, %v1045_v2  ;;  %v1047_v9 = vmax.f32 %v917_v3, 0.0 }
 0x1e5   : > { %v1046_v6 = vmax.f32 %v912_v5, 0.0  ;;  %v2671_v7 = vpop.f32.mrb[40].mxu0 }
 0x1e6   : > { %v927_v10 = vadd.f32 %v2671_v7, %v3242_v47  ;;  %v921_v11 = vpop.f32.mrb[41].mxu0 }
 0x1e7   : > { %v922_v12 = vadd.f32 %v3242_v47, %v921_v11  ;;  %2718 = vmatprep.mubr.msk.f32.mxu1 %vm1081_vm1, %v1046_v6 }
 0x1e8   : > { %2719 = vmatmul.mubr.msk.f32.gmra.mrb[26].mxu1 %vm1081_vm1, %v1047_v9  ;;  %v1049_v15 = vmax.f32 %v927_v10, 0.0 }
 0x1e9   : > { %v1048_v13 = vmax.f32 %v922_v12, 0.0  ;;  %v2674_v14 = vpop.f32.mrb[42].mxu0 }
 0x1ea   : > { %v937_v16 = vadd.f32 %v2674_v14, %v3242_v47  ;;  %v931_v17 = vpop.f32.mrb[43].mxu0 }
 0x1eb   : > { %v932_v18 = vadd.f32 %v3242_v47, %v931_v17  ;;  %2721 = vmatprep.mubr.msk.f32.mxu1 %vm1081_vm1, %v1048_v13 }
 0x1ec   : > { %2722 = vmatmul.mubr.msk.f32.gmra.mrb[28].mxu1 %vm1081_vm1, %v1049_v15  ;;  %v1051_v21 = vmax.f32 %v937_v16, 0.0 }
 0x1ed   : > { %v1050_v19 = vmax.f32 %v932_v18, 0.0  ;;  %v2677_v20 = vpop.f32.mrb[0].mxu1  ;;  %v1800_v18 = vld [vmem:[%s3546_s9] sm:$0xff] }
 0x1ee   : > { %v947_v22 = vadd.f32 %v2677_v20, %v3242_v47  ;;  %v941_v23 = vpop.f32.mrb[1].mxu1 }
 0x1ef   : > { %v942_v24 = vadd.f32 %v3242_v47, %v941_v23  ;;  %2724 = vmatprep.mubr.msk.f32.mxu1 %vm1081_vm1, %v1050_v19  ;;  %v1801_v19 = vld [vmem:[%s3546_s9 + $0x8] sm:$0xff]  ;;  %v3323_v23 = vld [vmem:[%s3543_s6] ss:$0 sm:$0xff] }
 0x1f0   : > { %2725 = vmatmul.mubr.msk.f32.gmra.mrb[30].mxu1 %vm1081_vm1, %v1051_v21  ;;  %v1053_v27 = vmax.f32 %v947_v22, 0.0  ;;  %v2929_v20 = vpack.c.bf16 %v1801_v19, %v1800_v18  ;;  %v1803_v21 = vld [vmem:[%s3546_s9 + $0x18] sm:$0xff] }
 0x1f1   : > { %v1052_v25 = vmax.f32 %v942_v24, 0.0  ;;  %v2680_v26 = vpop.f32.mrb[2].mxu1 }
 0x1f2   : > { %v957_v28 = vadd.f32 %v2680_v26, %v3242_v47  ;;  %v951_v29 = vpop.f32.mrb[3].mxu1  ;;  %2930 = vmatprep.subr.bf16.mxu1 %v2929_v20 }
 0x1f3   : > { %v952_v30 = vadd.f32 %v3242_v47, %v951_v29  ;;  %2727 = vmatprep.mubr.msk.f32.mxu1 %vm1081_vm1, %v1052_v25  ;;  %2932 = vmatpush3.bf16.msra.mxu1 %v2929_v20 }
 0x1f4   : > { %2728 = vmatmul.mubr.msk.f32.gmra.mrb[32].mxu1 %vm1081_vm1, %v1053_v27  ;;  %v1055_v33 = vmax.f32 %v957_v28, 0.0 }
 0x1f5   : > { %v1054_v31 = vmax.f32 %v952_v30, 0.0  ;;  %v2683_v32 = vpop.f32.mrb[4].mxu1 }
 0x1f6   : > { %v967_v34 = vadd.f32 %v2683_v32, %v3242_v47  ;;  %v961_v35 = vpop.f32.mrb[5].mxu1 }
 0x1f7   : > { %v962_v36 = vadd.f32 %v3242_v47, %v961_v35  ;;  %2730 = vmatprep.mubr.msk.f32.mxu1 %vm1081_vm1, %v1054_v31 }
 0x1f8   : > { %2731 = vmatmul.mubr.msk.f32.gmra.mrb[34].mxu1 %vm1081_vm1, %v1055_v33  ;;  %v1057_v39 = vmax.f32 %v967_v34, 0.0 }
 0x1f9   : > { %v1056_v37 = vmax.f32 %v962_v36, 0.0  ;;  %v2686_v38 = vpop.f32.mrb[6].mxu1 }
 0x1fa   : > { %v977_v40 = vadd.f32 %v2686_v38, %v3242_v47  ;;  %v971_v41 = vpop.f32.mrb[7].mxu1 }
 0x1fb   : > { %v972_v42 = vadd.f32 %v3242_v47, %v971_v41  ;;  %2733 = vmatprep.mubr.msk.f32.mxu1 %vm1081_vm1, %v1056_v37 }
 0x1fc   : > { %2734 = vmatmul.mubr.msk.f32.gmra.mrb[36].mxu1 %vm1081_vm1, %v1057_v39  ;;  %v1059_v44 = vmax.f32 %v977_v40, 0.0 }
 0x1fd   : > { %v1058_v43 = vmax.f32 %v972_v42, 0.0  ;;  %v2689_v8 = vpop.f32.mrb[8].mxu1 }
 0x1fe   : > { %v987_v45 = vadd.f32 %v2689_v8, %v3242_v47  ;;  %v981_v46 = vpop.f32.mrb[9].mxu1 }
 0x1ff   : > { %v982_v48 = vadd.f32 %v3242_v47, %v981_v46  ;;  %2736 = vmatprep.mubr.msk.f32.mxu1 %vm1081_vm1, %v1058_v43 }
 0x200   : > { %2737 = vmatmul.mubr.msk.f32.gmra.mrb[38].mxu1 %vm1081_vm1, %v1059_v44  ;;  %v1061_v51 = vmax.f32 %v987_v45, 0.0 }
 0x201   : > { %v1060_v49 = vmax.f32 %v982_v48, 0.0  ;;  %v2692_v50 = vpop.f32.mrb[10].mxu1 }
 0x202   : > { %v997_v52 = vadd.f32 %v2692_v50, %v3242_v47  ;;  %v991_v53 = vpop.f32.mrb[11].mxu1 }
 0x203   : > { %v992_v54 = vadd.f32 %v3242_v47, %v991_v53  ;;  %2739 = vmatprep.mubr.msk.f32.mxu1 %vm1081_vm1, %v1060_v49 }
 0x204   : > { %2740 = vmatmul.mubr.msk.f32.gmra.mrb[40].mxu1 %vm1081_vm1, %v1061_v51  ;;  %v1063_v57 = vmax.f32 %v997_v52, 0.0 }
 0x205   : > { %v1062_v55 = vmax.f32 %v992_v54, 0.0  ;;  %v2695_v56 = vpop.f32.mrb[12].mxu1 }
 0x206   : > { %v1007_v58 = vadd.f32 %v2695_v56, %v3242_v47  ;;  %v1001_v59 = vpop.f32.mrb[13].mxu1 }
 0x207   : > { %v1002_v60 = vadd.f32 %v3242_v47, %v1001_v59  ;;  %2742 = vmatprep.mubr.msk.f32.mxu1 %vm1081_vm1, %v1062_v55 }
 0x208   : > { %2743 = vmatmul.mubr.msk.f32.gmra.mrb[42].mxu1 %vm1081_vm1, %v1063_v57  ;;  %v1065_v63 = vmax.f32 %v1007_v58, 0.0 }
 0x209   : > { %v1064_v61 = vmax.f32 %v1002_v60, 0.0  ;;  %v2698_v62 = vpop.f32.mrb[14].mxu1 }
 0x20a   : > { %v1017_v0 = vadd.f32 %v2698_v62, %v3242_v47  ;;  %v1011_v1 = vpop.f32.mrb[15].mxu1 }
 0x20b   : > { %v1012_v2 = vadd.f32 %v3242_v47, %v1011_v1  ;;  %2745 = vmatprep.mubr.msk.f32.mxu1 %vm1081_vm1, %v1064_v61 }
 0x20c   : > { %2746 = vmatmul.mubr.msk.f32.gmra.mrb[44].mxu1 %vm1081_vm1, %v1065_v63  ;;  %v1067_v5 = vmax.f32 %v1017_v0, 0.0 }
 0x20d   : > { %v1066_v3 = vmax.f32 %v1012_v2, 0.0  ;;  %v2701_v4 = vpop.f32.mrb[16].mxu1 }
 0x20e   : > { %v1027_v6 = vadd.f32 %v2701_v4, %v3242_v47  ;;  %v1021_v7 = vpop.f32.mrb[17].mxu1 }
 0x20f   : > { %v1022_v9 = vadd.f32 %v3242_v47, %v1021_v7  ;;  %2748 = vmatprep.mubr.msk.f32.mxu1 %vm1081_vm1, %v1066_v3 }
 0x210   : > { %2749 = vmatmul.mubr.msk.f32.gmra.mrb[46].mxu1 %vm1081_vm1, %v1067_v5  ;;  %v1069_v12 = vmax.f32 %v1027_v6, 0.0 }
 0x211   : > { %v1068_v10 = vmax.f32 %v1022_v9, 0.0  ;;  %v2704_v11 = vpop.f32.mrb[18].mxu1 }
 0x212   : > { %v1037_v13 = vadd.f32 %v2704_v11, %v3242_v47  ;;  %v1031_v14 = vpop.f32.mrb[19].mxu1 }
 0x213   : > { %v1032_v15 = vadd.f32 %v3242_v47, %v1031_v14  ;;  %2751 = vmatprep.mubr.msk.f32.mxu1 %vm1081_vm1, %v1068_v10  ;;  %v1802_v47 = vld [vmem:[%s3546_s9 + $0x10] sm:$0xff] }
 0x214   : > { %2752 = vmatmul.mubr.msk.f32.gmra.mrb[48].mxu1 %vm1081_vm1, %v1069_v12  ;;  %v1071_v17 = vmax.f32 %v1037_v13, 0.0  ;;  %v2933_v22 = vpack.c.bf16 %v1803_v21, %v1802_v47 }
 0x215   : > { %v1070_v16 = vmax.f32 %v1032_v15, 0.0 }
 0x216   : > { %2934 = vmatprep.subr.bf16.mxu1 %v2933_v22 }
 0x217   : > { %2754 = vmatprep.mubr.msk.f32.mxu1 %vm1081_vm1, %v1070_v16  ;;  %2936 = vmatpush3.bf16.msra.mxu1 %v2933_v22 }
 0x218   : > { %2755 = vmatmul.mubr.msk.f32.gmra.mrb[50].mxu1 %vm1081_vm1, %v1071_v17 }
 0x2af   : > { %v2711_v24 = vpop.f32.mrb[20].mxu1 }
 0x2b0   : > { %v1250_v25 = vadd.f32 %v2711_v24, %v3323_v23  ;;  %v1244_v26 = vpop.f32.mrb[21].mxu1 }
 0x2b1   : > { %v1245_v27 = vadd.f32 %v3323_v23, %v1244_v26 }
 0x2b2   : > { %v1404_v30 = vmax.f32 %v1250_v25, 0.0 }
 0x2b3   : > { %v1403_v28 = vmax.f32 %v1245_v27, 0.0  ;;  %v2714_v29 = vpop.f32.mrb[22].mxu1 }
 0x2b4   : > { %v1260_v31 = vadd.f32 %v2714_v29, %v3323_v23  ;;  %v1254_v32 = vpop.f32.mrb[23].mxu1 }
 0x2b5   : > { %v1255_v33 = vadd.f32 %v3323_v23, %v1254_v32  ;;  %2765 = vmatprep.mubr.msk.f32.mxu0 %vm1446_vm2, %v1403_v28 }
 0x2b6   : > { %2766 = vmatmul.mubr.msk.f32.vlgmr.msra.gmra.mrb[44].mxu0 %vm1446_vm2, %v1404_v30  ;;  %v1406_v36 = vmax.f32 %v1260_v31, 0.0 }
 0x2b7   : > { %v1405_v34 = vmax.f32 %v1255_v33, 0.0  ;;  %v2717_v35 = vpop.f32.mrb[24].mxu1 }
 0x2b8   : > { %v1270_v37 = vadd.f32 %v2717_v35, %v3323_v23  ;;  %v1264_v38 = vpop.f32.mrb[25].mxu1 }
 0x2b9   : > { %v1265_v39 = vadd.f32 %v3323_v23, %v1264_v38  ;;  %2768 = vmatprep.mubr.msk.f32.mxu0 %vm1446_vm2, %v1405_v34 }
 0x2ba   : > { %2769 = vmatmul.mubr.msk.f32.gmra.mrb[46].mxu0 %vm1446_vm2, %v1406_v36  ;;  %v1408_v42 = vmax.f32 %v1270_v37, 0.0 }
 0x2bb   : > { %v1407_v40 = vmax.f32 %v1265_v39, 0.0  ;;  %v2720_v41 = vpop.f32.mrb[26].mxu1 }
 0x2bc   : > { %v1280_v43 = vadd.f32 %v2720_v41, %v3323_v23  ;;  %v1274_v8 = vpop.f32.mrb[27].mxu1 }
 0x2bd   : > { %v1275_v44 = vadd.f32 %v3323_v23, %v1274_v8  ;;  %2771 = vmatprep.mubr.msk.f32.mxu0 %vm1446_vm2, %v1407_v40 }
 0x2be   : > { %2772 = vmatmul.mubr.msk.f32.gmra.mrb[48].mxu0 %vm1446_vm2, %v1408_v42  ;;  %v1410_v48 = vmax.f32 %v1280_v43, 0.0 }
 0x2bf   : > { %v1409_v45 = vmax.f32 %v1275_v44, 0.0  ;;  %v2723_v46 = vpop.f32.mrb[28].mxu1 }
 0x2c0   : > { %v1290_v49 = vadd.f32 %v2723_v46, %v3323_v23  ;;  %v1284_v50 = vpop.f32.mrb[29].mxu1 }
 0x2c1   : > { %v1285_v51 = vadd.f32 %v3323_v23, %v1284_v50  ;;  %2774 = vmatprep.mubr.msk.f32.mxu0 %vm1446_vm2, %v1409_v45 }
 0x2c2   : > { %2775 = vmatmul.mubr.msk.f32.gmra.mrb[50].mxu0 %vm1446_vm2, %v1410_v48  ;;  %v1412_v54 = vmax.f32 %v1290_v49, 0.0 }
 0x2c3   : > { %v1411_v52 = vmax.f32 %v1285_v51, 0.0  ;;  %v2726_v53 = vpop.f32.mrb[30].mxu1 }
 0x2c4   : > { %v1300_v55 = vadd.f32 %v2726_v53, %v3323_v23  ;;  %v1294_v56 = vpop.f32.mrb[31].mxu1 }
 0x2c5   : > { %v1295_v57 = vadd.f32 %v3323_v23, %v1294_v56  ;;  %2777 = vmatprep.mubr.msk.f32.mxu0 %vm1446_vm2, %v1411_v52 }
 0x2c6   : > { %2778 = vmatmul.mubr.msk.f32.gmra.mrb[52].mxu0 %vm1446_vm2, %v1412_v54  ;;  %v1414_v60 = vmax.f32 %v1300_v55, 0.0 }
 0x2c7   : > { %v1413_v58 = vmax.f32 %v1295_v57, 0.0  ;;  %v2729_v59 = vpop.f32.mrb[32].mxu1  ;;  %v3392_v57 = vld [vmem:[%s3545_s8] ss:$0 sm:$0xff] }
 0x2c8   : > { %v1310_v61 = vadd.f32 %v2729_v59, %v3323_v23  ;;  %v1304_v62 = vpop.f32.mrb[33].mxu1 }
 0x2c9   : > { %v1305_v63 = vadd.f32 %v3323_v23, %v1304_v62  ;;  %2780 = vmatprep.mubr.msk.f32.mxu0 %vm1446_vm2, %v1413_v58 }
 0x2ca   : > { %2781 = vmatmul.mubr.msk.f32.gmra.mrb[54].mxu0 %vm1446_vm2, %v1414_v60  ;;  %v1416_v2 = vmax.f32 %v1310_v61, 0.0 }
 0x2cb   : > { %v1415_v0 = vmax.f32 %v1305_v63, 0.0  ;;  %v2732_v1 = vpop.f32.mrb[34].mxu1 }
 0x2cc   : > { %v1320_v3 = vadd.f32 %v2732_v1, %v3323_v23  ;;  %v1314_v4 = vpop.f32.mrb[35].mxu1 }
 0x2cd   : > { %v1315_v5 = vadd.f32 %v3323_v23, %v1314_v4  ;;  %2783 = vmatprep.mubr.msk.f32.mxu0 %vm1446_vm2, %v1415_v0 }
 0x2ce   : > { %2784 = vmatmul.mubr.msk.f32.gmra.mrb[56].mxu0 %vm1446_vm2, %v1416_v2  ;;  %v1418_v9 = vmax.f32 %v1320_v3, 0.0 }
 0x2cf   : > { %v1417_v6 = vmax.f32 %v1315_v5, 0.0  ;;  %v2735_v7 = vpop.f32.mrb[36].mxu1 }
 0x2d0   : > { %v1330_v10 = vadd.f32 %v2735_v7, %v3323_v23  ;;  %v1324_v11 = vpop.f32.mrb[37].mxu1 }
 0x2d1   : > { %v1325_v12 = vadd.f32 %v3323_v23, %v1324_v11  ;;  %2786 = vmatprep.mubr.msk.f32.mxu0 %vm1446_vm2, %v1417_v6 }
 0x2d2   : > { %2787 = vmatmul.mubr.msk.f32.gmra.mrb[58].mxu0 %vm1446_vm2, %v1418_v9  ;;  %v1420_v15 = vmax.f32 %v1330_v10, 0.0 }
 0x2d3   : > { %v1419_v13 = vmax.f32 %v1325_v12, 0.0  ;;  %v2738_v14 = vpop.f32.mrb[38].mxu1 }
 0x2d4   : > { %v1340_v16 = vadd.f32 %v2738_v14, %v3323_v23  ;;  %v1334_v17 = vpop.f32.mrb[39].mxu1 }
 0x2d5   : > { %v1335_v18 = vadd.f32 %v3323_v23, %v1334_v17  ;;  %2789 = vmatprep.mubr.msk.f32.mxu0 %vm1446_vm2, %v1419_v13 }
 0x2d6   : > { %2790 = vmatmul.mubr.msk.f32.gmra.mrb[60].mxu0 %vm1446_vm2, %v1420_v15  ;;  %v1422_v20 = vmax.f32 %v1340_v16, 0.0 }
 0x2d7   : > { %v1421_v19 = vmax.f32 %v1335_v18, 0.0  ;;  %v2741_v47 = vpop.f32.mrb[40].mxu1 }
 0x2d8   : > { %v1350_v21 = vadd.f32 %v2741_v47, %v3323_v23  ;;  %v1344_v22 = vpop.f32.mrb[41].mxu1 }
 0x2d9   : > { %v1345_v24 = vadd.f32 %v3323_v23, %v1344_v22  ;;  %2792 = vmatprep.mubr.msk.f32.mxu0 %vm1446_vm2, %v1421_v19 }
 0x2da   : > { %2793 = vmatmul.mubr.msk.f32.gmra.mrb[62].mxu0 %vm1446_vm2, %v1422_v20  ;;  %v1424_v27 = vmax.f32 %v1350_v21, 0.0 }
 0x2db   : > { %v1423_v25 = vmax.f32 %v1345_v24, 0.0  ;;  %v2744_v26 = vpop.f32.mrb[42].mxu1 }
 0x2dc   : > { %v1360_v28 = vadd.f32 %v2744_v26, %v3323_v23  ;;  %v1354_v29 = vpop.f32.mrb[43].mxu1 }
 0x2dd   : > { %v1355_v30 = vadd.f32 %v3323_v23, %v1354_v29  ;;  %2795 = vmatprep.mubr.msk.f32.mxu0 %vm1446_vm2, %v1423_v25 }
 0x2de   : > { %2796 = vmatmul.mubr.msk.f32.gmra.mrb[64].mxu0 %vm1446_vm2, %v1424_v27  ;;  %v1426_v33 = vmax.f32 %v1360_v28, 0.0 }
 0x2df   : > { %v1425_v31 = vmax.f32 %v1355_v30, 0.0  ;;  %v2747_v32 = vpop.f32.mrb[44].mxu1 }
 0x2e0   : > { %v1370_v34 = vadd.f32 %v2747_v32, %v3323_v23  ;;  %v1364_v35 = vpop.f32.mrb[45].mxu1 }
 0x2e1   : > { %v1365_v36 = vadd.f32 %v3323_v23, %v1364_v35  ;;  %2798 = vmatprep.mubr.msk.f32.mxu0 %vm1446_vm2, %v1425_v31 }
 0x2e2   : > { %2799 = vmatmul.mubr.msk.f32.gmra.mrb[66].mxu0 %vm1446_vm2, %v1426_v33  ;;  %v1428_v39 = vmax.f32 %v1370_v34, 0.0 }
 0x2e3   : > { %v1427_v37 = vmax.f32 %v1365_v36, 0.0  ;;  %v2750_v38 = vpop.f32.mrb[46].mxu1 }
 0x2e4   : > { %v1380_v40 = vadd.f32 %v2750_v38, %v3323_v23  ;;  %v1374_v41 = vpop.f32.mrb[47].mxu1 }
 0x2e5   : > { %v1375_v42 = vadd.f32 %v3323_v23, %v1374_v41  ;;  %2801 = vmatprep.mubr.msk.f32.mxu0 %vm1446_vm2, %v1427_v37 }
 0x2e6   : > { %2802 = vmatmul.mubr.msk.f32.gmra.mrb[68].mxu0 %vm1446_vm2, %v1428_v39  ;;  %v1430_v44 = vmax.f32 %v1380_v40, 0.0 }
 0x2e7   : > { %v1429_v43 = vmax.f32 %v1375_v42, 0.0  ;;  %v2753_v8 = vpop.f32.mrb[48].mxu1 }
 0x2e8   : > { %v1390_v45 = vadd.f32 %v2753_v8, %v3323_v23  ;;  %v1384_v46 = vpop.f32.mrb[49].mxu1 }
 0x2e9   : > { %v1385_v48 = vadd.f32 %v3323_v23, %v1384_v46  ;;  %2804 = vmatprep.mubr.msk.f32.mxu0 %vm1446_vm2, %v1429_v43 }
 0x2ea   : > { %2805 = vmatmul.mubr.msk.f32.gmra.mrb[70].mxu0 %vm1446_vm2, %v1430_v44  ;;  %v1432_v51 = vmax.f32 %v1390_v45, 0.0 }
 0x2eb   : > { %v1431_v49 = vmax.f32 %v1385_v48, 0.0  ;;  %v2756_v50 = vpop.f32.mrb[50].mxu1 }
 0x2ec   : > { %v1400_v52 = vadd.f32 %v2756_v50, %v3323_v23  ;;  %v1394_v53 = vpop.f32.mrb[51].mxu1 }
 0x2ed   : > { %v1395_v54 = vadd.f32 %v3323_v23, %v1394_v53  ;;  %2807 = vmatprep.mubr.msk.f32.mxu0 %vm1446_vm2, %v1431_v49 }
 0x2ee   : > { %2808 = vmatmul.mubr.msk.f32.gmra.mrb[72].mxu0 %vm1446_vm2, %v1432_v51  ;;  %v1434_v56 = vmax.f32 %v1400_v52, 0.0 }
 0x2ef   : > { %v1433_v55 = vmax.f32 %v1395_v54, 0.0 }
 0x2f1   : > { %2810 = vmatprep.mubr.msk.f32.mxu0 %vm1446_vm2, %v1433_v55 }
 0x2f2   : > { %2811 = vmatmul.mubr.msk.f32.gmra.mrb[74].mxu0 %vm1446_vm2, %v1434_v56 }
 0x389   : > { %v2767_v58 = vpop.f32.mrb[44].mxu0 }
 0x38a   : > { %v1615_v59 = vadd.f32 %v2767_v58, %v3392_v57  ;;  %v1609_v60 = vpop.f32.mrb[45].mxu0 }
 0x38b   : > { %v1610_v23 = vadd.f32 %v3392_v57, %v1609_v60 }
 0x38c   : > { %v1769_v63 = vmax.f32 %v1615_v59, 0.0 }
 0x38d   : > { %v1768_v61 = vmax.f32 %v1610_v23, 0.0  ;;  %v2770_v62 = vpop.f32.mrb[46].mxu0 }
 0x38e   : > { %v1625_v0 = vadd.f32 %v2770_v62, %v3392_v57  ;;  %v1619_v1 = vpop.f32.mrb[47].mxu0 }
 0x38f   : > { %v1620_v2 = vadd.f32 %v3392_v57, %v1619_v1  ;;  %2821 = vmatprep.mubr.msk.f32.mxu1 %vm1446_vm2, %v1768_v61 }
 0x390   : > { %2822 = vmatmul.mubr.msk.f32.vlgmr.msra.gmra.mrb[52].mxu1 %vm1446_vm2, %v1769_v63  ;;  %v1771_v5 = vmax.f32 %v1625_v0, 0.0 }
 0x391   : > { %v1770_v3 = vmax.f32 %v1620_v2, 0.0  ;;  %v2773_v4 = vpop.f32.mrb[48].mxu0 }
 0x392   : > { %v1635_v6 = vadd.f32 %v2773_v4, %v3392_v57  ;;  %v1629_v7 = vpop.f32.mrb[49].mxu0 }
 0x393   : > { %v1630_v9 = vadd.f32 %v3392_v57, %v1629_v7  ;;  %2824 = vmatprep.mubr.msk.f32.mxu1 %vm1446_vm2, %v1770_v3 }
 0x394   : > { %2825 = vmatmul.mubr.msk.f32.gmra.mrb[54].mxu1 %vm1446_vm2, %v1771_v5  ;;  %v1773_v12 = vmax.f32 %v1635_v6, 0.0 }
 0x395   : > { %v1772_v10 = vmax.f32 %v1630_v9, 0.0  ;;  %v2776_v11 = vpop.f32.mrb[50].mxu0 }
 0x396   : > { %v1645_v13 = vadd.f32 %v2776_v11, %v3392_v57  ;;  %v1639_v14 = vpop.f32.mrb[51].mxu0 }
 0x397   : > { %v1640_v15 = vadd.f32 %v3392_v57, %v1639_v14  ;;  %2827 = vmatprep.mubr.msk.f32.mxu1 %vm1446_vm2, %v1772_v10 }
 0x398   : > { %2828 = vmatmul.mubr.msk.f32.gmra.mrb[56].mxu1 %vm1446_vm2, %v1773_v12  ;;  %v1775_v18 = vmax.f32 %v1645_v13, 0.0 }
 0x399   : > { %v1774_v16 = vmax.f32 %v1640_v15, 0.0  ;;  %v2779_v17 = vpop.f32.mrb[52].mxu0 }
 0x39a   : > { %v1655_v19 = vadd.f32 %v2779_v17, %v3392_v57  ;;  %v1649_v47 = vpop.f32.mrb[53].mxu0 }
 0x39b   : > { %v1650_v20 = vadd.f32 %v3392_v57, %v1649_v47  ;;  %2830 = vmatprep.mubr.msk.f32.mxu1 %vm1446_vm2, %v1774_v16 }
 0x39c   : > { %2831 = vmatmul.mubr.msk.f32.gmra.mrb[58].mxu1 %vm1446_vm2, %v1775_v18  ;;  %v1777_v24 = vmax.f32 %v1655_v19, 0.0 }
 0x39d   : > { %v1776_v21 = vmax.f32 %v1650_v20, 0.0  ;;  %v2782_v22 = vpop.f32.mrb[54].mxu0 }
 0x39e   : > { %v1665_v25 = vadd.f32 %v2782_v22, %v3392_v57  ;;  %v1659_v26 = vpop.f32.mrb[55].mxu0 }
 0x39f   : > { %v1660_v27 = vadd.f32 %v3392_v57, %v1659_v26  ;;  %2833 = vmatprep.mubr.msk.f32.mxu1 %vm1446_vm2, %v1776_v21 }
 0x3a0   : > { %2834 = vmatmul.mubr.msk.f32.gmra.mrb[60].mxu1 %vm1446_vm2, %v1777_v24  ;;  %v1779_v30 = vmax.f32 %v1665_v25, 0.0 }
 0x3a1   : > { %v1778_v28 = vmax.f32 %v1660_v27, 0.0  ;;  %v2785_v29 = vpop.f32.mrb[56].mxu0  ;;  %v3461_v27 = vld [vmem:[%s3547_s10] ss:$0 sm:$0xff] }
 0x3a2   : > { %v1675_v31 = vadd.f32 %v2785_v29, %v3392_v57  ;;  %v1669_v32 = vpop.f32.mrb[57].mxu0 }
 0x3a3   : > { %v1670_v33 = vadd.f32 %v3392_v57, %v1669_v32  ;;  %2836 = vmatprep.mubr.msk.f32.mxu1 %vm1446_vm2, %v1778_v28 }
 0x3a4   : > { %2837 = vmatmul.mubr.msk.f32.gmra.mrb[62].mxu1 %vm1446_vm2, %v1779_v30  ;;  %v1781_v36 = vmax.f32 %v1675_v31, 0.0 }
 0x3a5   : > { %v1780_v34 = vmax.f32 %v1670_v33, 0.0  ;;  %v2788_v35 = vpop.f32.mrb[58].mxu0 }
 0x3a6   : > { %v1685_v37 = vadd.f32 %v2788_v35, %v3392_v57  ;;  %v1679_v38 = vpop.f32.mrb[59].mxu0 }
 0x3a7   : > { %v1680_v39 = vadd.f32 %v3392_v57, %v1679_v38  ;;  %2839 = vmatprep.mubr.msk.f32.mxu1 %vm1446_vm2, %v1780_v34 }
 0x3a8   : > { %2840 = vmatmul.mubr.msk.f32.gmra.mrb[64].mxu1 %vm1446_vm2, %v1781_v36  ;;  %v1783_v42 = vmax.f32 %v1685_v37, 0.0 }
 0x3a9   : > { %v1782_v40 = vmax.f32 %v1680_v39, 0.0  ;;  %v2791_v41 = vpop.f32.mrb[60].mxu0 }
 0x3aa   : > { %v1695_v43 = vadd.f32 %v2791_v41, %v3392_v57  ;;  %v1689_v8 = vpop.f32.mrb[61].mxu0 }
 0x3ab   : > { %v1690_v44 = vadd.f32 %v3392_v57, %v1689_v8  ;;  %2842 = vmatprep.mubr.msk.f32.mxu1 %vm1446_vm2, %v1782_v40 }
 0x3ac   : > { %2843 = vmatmul.mubr.msk.f32.gmra.mrb[66].mxu1 %vm1446_vm2, %v1783_v42  ;;  %v1785_v48 = vmax.f32 %v1695_v43, 0.0 }
 0x3ad   : > { %v1784_v45 = vmax.f32 %v1690_v44, 0.0  ;;  %v2794_v46 = vpop.f32.mrb[62].mxu0 }
 0x3ae   : > { %v1705_v49 = vadd.f32 %v2794_v46, %v3392_v57  ;;  %v1699_v50 = vpop.f32.mrb[63].mxu0 }
 0x3af   : > { %v1700_v51 = vadd.f32 %v3392_v57, %v1699_v50  ;;  %2845 = vmatprep.mubr.msk.f32.mxu1 %vm1446_vm2, %v1784_v45 }
 0x3b0   : > { %2846 = vmatmul.mubr.msk.f32.gmra.mrb[68].mxu1 %vm1446_vm2, %v1785_v48  ;;  %v1787_v54 = vmax.f32 %v1705_v49, 0.0 }
 0x3b1   : > { %v1786_v52 = vmax.f32 %v1700_v51, 0.0  ;;  %v2797_v53 = vpop.f32.mrb[64].mxu0 }
 0x3b2   : > { %v1715_v55 = vadd.f32 %v2797_v53, %v3392_v57  ;;  %v1709_v56 = vpop.f32.mrb[65].mxu0 }
 0x3b3   : > { %v1710_v58 = vadd.f32 %v3392_v57, %v1709_v56  ;;  %2848 = vmatprep.mubr.msk.f32.mxu1 %vm1446_vm2, %v1786_v52 }
 0x3b4   : > { %2849 = vmatmul.mubr.msk.f32.gmra.mrb[70].mxu1 %vm1446_vm2, %v1787_v54  ;;  %v1789_v23 = vmax.f32 %v1715_v55, 0.0 }
 0x3b5   : > { %v1788_v59 = vmax.f32 %v1710_v58, 0.0  ;;  %v2800_v60 = vpop.f32.mrb[66].mxu0 }
 0x3b6   : > { %v1725_v61 = vadd.f32 %v2800_v60, %v3392_v57  ;;  %v1719_v62 = vpop.f32.mrb[67].mxu0 }
 0x3b7   : > { %v1720_v63 = vadd.f32 %v3392_v57, %v1719_v62  ;;  %2851 = vmatprep.mubr.msk.f32.mxu1 %vm1446_vm2, %v1788_v59 }
 0x3b8   : > { %2852 = vmatmul.mubr.msk.f32.gmra.mrb[72].mxu1 %vm1446_vm2, %v1789_v23  ;;  %v1791_v2 = vmax.f32 %v1725_v61, 0.0 }
 0x3b9   : > { %v1790_v0 = vmax.f32 %v1720_v63, 0.0  ;;  %v2803_v1 = vpop.f32.mrb[68].mxu0 }
 0x3ba   : > { %v1735_v3 = vadd.f32 %v2803_v1, %v3392_v57  ;;  %v1729_v4 = vpop.f32.mrb[69].mxu0 }
 0x3bb   : > { %v1730_v5 = vadd.f32 %v3392_v57, %v1729_v4  ;;  %2854 = vmatprep.mubr.msk.f32.mxu1 %vm1446_vm2, %v1790_v0 }
 0x3bc   : > { %2855 = vmatmul.mubr.msk.f32.gmra.mrb[74].mxu1 %vm1446_vm2, %v1791_v2  ;;  %v1793_v9 = vmax.f32 %v1735_v3, 0.0 }
 0x3bd   : > { %v1792_v6 = vmax.f32 %v1730_v5, 0.0  ;;  %v2806_v7 = vpop.f32.mrb[70].mxu0 }
 0x3be   : > { %v1745_v10 = vadd.f32 %v2806_v7, %v3392_v57  ;;  %v1739_v11 = vpop.f32.mrb[71].mxu0 }
 0x3bf   : > { %v1740_v12 = vadd.f32 %v3392_v57, %v1739_v11  ;;  %2857 = vmatprep.mubr.msk.f32.mxu1 %vm1446_vm2, %v1792_v6 }
 0x3c0   : > { %2858 = vmatmul.mubr.msk.f32.gmra.mrb[76].mxu1 %vm1446_vm2, %v1793_v9  ;;  %v1795_v15 = vmax.f32 %v1745_v10, 0.0 }
 0x3c1   : > { %v1794_v13 = vmax.f32 %v1740_v12, 0.0  ;;  %v2809_v14 = vpop.f32.mrb[72].mxu0 }
 0x3c2   : > { %v1755_v16 = vadd.f32 %v2809_v14, %v3392_v57  ;;  %v1749_v17 = vpop.f32.mrb[73].mxu0 }
 0x3c3   : > { %v1750_v18 = vadd.f32 %v3392_v57, %v1749_v17  ;;  %2860 = vmatprep.mubr.msk.f32.mxu1 %vm1446_vm2, %v1794_v13 }
 0x3c4   : > { %2861 = vmatmul.mubr.msk.f32.gmra.mrb[78].mxu1 %vm1446_vm2, %v1795_v15  ;;  %v1797_v20 = vmax.f32 %v1755_v16, 0.0 }
 0x3c5   : > { %v1796_v19 = vmax.f32 %v1750_v18, 0.0  ;;  %v2812_v47 = vpop.f32.mrb[74].mxu0 }
 0x3c6   : > { %v1765_v21 = vadd.f32 %v2812_v47, %v3392_v57  ;;  %v1759_v22 = vpop.f32.mrb[75].mxu0 }
 0x3c7   : > { %v1760_v24 = vadd.f32 %v3392_v57, %v1759_v22  ;;  %2863 = vmatprep.mubr.msk.f32.mxu1 %vm1446_vm2, %v1796_v19 }
 0x3c8   : > { %2864 = vmatmul.mubr.msk.f32.gmra.mrb[80].mxu1 %vm1446_vm2, %v1797_v20  ;;  %v1799_v26 = vmax.f32 %v1765_v21, 0.0 }
 0x3c9   : > { %v1798_v25 = vmax.f32 %v1760_v24, 0.0 }
 0x3cb   : > { %2866 = vmatprep.mubr.msk.f32.mxu1 %vm1446_vm2, %v1798_v25 }
 0x3cc   : > { %2867 = vmatmul.mubr.msk.f32.gmra.mrb[82].mxu1 %vm1446_vm2, %v1799_v26 }
 0x463   : > { %v2823_v57 = vpop.f32.mrb[52].mxu1 }
 0x464   : > { %v1979_v28 = vadd.f32 %v2823_v57, %v3461_v27  ;;  %v1973_v29 = vpop.f32.mrb[53].mxu1 }
 0x465   : > { %v1974_v30 = vadd.f32 %v3461_v27, %v1973_v29 }
 0x466   : > { %2133 = vst [vmem:[%s3468_s27 + $0x8] sm:$0xff] %v1979_v28 }
 0x467   : > { %2132 = vst [vmem:[%s3468_s27] sm:$0xff] %v1974_v30  ;;  %v2826_v31 = vpop.f32.mrb[54].mxu1 }
 0x468   : > { %v1989_v32 = vadd.f32 %v2826_v31, %v3461_v27  ;;  %v1983_v33 = vpop.f32.mrb[55].mxu1 }
 0x469   : > { %v1984_v34 = vadd.f32 %v3461_v27, %v1983_v33 }
 0x46a   : > { %2135 = vst [vmem:[%s3468_s27 + $0x18] sm:$0xff] %v1989_v32 }
 0x46b   : > { %2134 = vst [vmem:[%s3468_s27 + $0x10] sm:$0xff] %v1984_v34  ;;  %v2829_v35 = vpop.f32.mrb[56].mxu1 }
 0x46c   : > { %v1999_v36 = vadd.f32 %v2829_v35, %v3461_v27  ;;  %v1993_v37 = vpop.f32.mrb[57].mxu1 }
 0x46d   : > { %v1994_v38 = vadd.f32 %v3461_v27, %v1993_v37 }
 0x46e   : > { %2137 = vst [vmem:[%s3468_s27 + $0x28] sm:$0xff] %v1999_v36 }
 0x46f   : > { %2136 = vst [vmem:[%s3468_s27 + $0x20] sm:$0xff] %v1994_v38  ;;  %v2832_v39 = vpop.f32.mrb[58].mxu1 }
 0x470   : > { %v2009_v40 = vadd.f32 %v2832_v39, %v3461_v27  ;;  %v2003_v41 = vpop.f32.mrb[59].mxu1 }
 0x471   : > { %v2004_v42 = vadd.f32 %v3461_v27, %v2003_v41 }
 0x472   : > { %2139 = vst [vmem:[%s3468_s27 + $0x38] sm:$0xff] %v2009_v40 }
 0x473   : > { %2138 = vst [vmem:[%s3468_s27 + $0x30] sm:$0xff] %v2004_v42  ;;  %v2835_v43 = vpop.f32.mrb[60].mxu1 }
 0x474   : > { %v2019_v8 = vadd.f32 %v2835_v43, %v3461_v27  ;;  %v2013_v44 = vpop.f32.mrb[61].mxu1 }
 0x475   : > { %v2014_v45 = vadd.f32 %v3461_v27, %v2013_v44 }
 0x476   : > { %2141 = vst [vmem:[%s3468_s27 + $0x48] sm:$0xff] %v2019_v8 }
 0x477   : > { %2140 = vst [vmem:[%s3468_s27 + $0x40] sm:$0xff] %v2014_v45  ;;  %v2838_v46 = vpop.f32.mrb[62].mxu1 }
 0x478   : > { %v2029_v48 = vadd.f32 %v2838_v46, %v3461_v27  ;;  %v2023_v49 = vpop.f32.mrb[63].mxu1 }
 0x479   : > { %v2024_v50 = vadd.f32 %v3461_v27, %v2023_v49 }
 0x47a   : > { %2143 = vst [vmem:[%s3468_s27 + $0x58] sm:$0xff] %v2029_v48 }
 0x47b   : > { %2142 = vst [vmem:[%s3468_s27 + $0x50] sm:$0xff] %v2024_v50  ;;  %v2841_v51 = vpop.f32.mrb[64].mxu1 }
 0x47c   : > { %v2039_v52 = vadd.f32 %v2841_v51, %v3461_v27  ;;  %v2033_v53 = vpop.f32.mrb[65].mxu1 }
 0x47d   : > { %v2034_v54 = vadd.f32 %v3461_v27, %v2033_v53 }
 0x47e   : > { %2145 = vst [vmem:[%s3468_s27 + $0x68] sm:$0xff] %v2039_v52 }
 0x47f   : > { %2144 = vst [vmem:[%s3468_s27 + $0x60] sm:$0xff] %v2034_v54  ;;  %v2844_v55 = vpop.f32.mrb[66].mxu1 }
 0x480   : > { %v2049_v56 = vadd.f32 %v2844_v55, %v3461_v27  ;;  %v2043_v58 = vpop.f32.mrb[67].mxu1 }
 0x481   : > { %v2044_v59 = vadd.f32 %v3461_v27, %v2043_v58 }
 0x482   : > { %2147 = vst [vmem:[%s3468_s27 + $0x78] sm:$0xff] %v2049_v56 }
 0x483   : > { %2146 = vst [vmem:[%s3468_s27 + $0x70] sm:$0xff] %v2044_v59  ;;  %v2847_v60 = vpop.f32.mrb[68].mxu1 }
 0x484   : > { %v2059_v23 = vadd.f32 %v2847_v60, %v3461_v27  ;;  %v2053_v61 = vpop.f32.mrb[69].mxu1 }
 0x485   : > { %v2054_v62 = vadd.f32 %v3461_v27, %v2053_v61 }
 0x486   : > { %2149 = vst [vmem:[%s3468_s27 + $0x88] sm:$0xff] %v2059_v23 }
 0x487   : > { %2148 = vst [vmem:[%s3468_s27 + $0x80] sm:$0xff] %v2054_v62  ;;  %v2850_v63 = vpop.f32.mrb[70].mxu1 }
 0x488   : > { %v2069_v0 = vadd.f32 %v2850_v63, %v3461_v27  ;;  %v2063_v1 = vpop.f32.mrb[71].mxu1 }
 0x489   : > { %v2064_v2 = vadd.f32 %v3461_v27, %v2063_v1 }
 0x48a   : > { %2151 = vst [vmem:[%s3468_s27 + $0x98] sm:$0xff] %v2069_v0 }
 0x48b   : > { %2150 = vst [vmem:[%s3468_s27 + $0x90] sm:$0xff] %v2064_v2  ;;  %v2853_v3 = vpop.f32.mrb[72].mxu1 }
 0x48c   : > { %v2079_v4 = vadd.f32 %v2853_v3, %v3461_v27  ;;  %v2073_v5 = vpop.f32.mrb[73].mxu1 }
 0x48d   : > { %v2074_v6 = vadd.f32 %v3461_v27, %v2073_v5 }
 0x48e   : > { %2153 = vst [vmem:[%s3468_s27 + $0xa8] sm:$0xff] %v2079_v4 }
 0x48f   : > { %2152 = vst [vmem:[%s3468_s27 + $0xa0] sm:$0xff] %v2074_v6  ;;  %v2856_v7 = vpop.f32.mrb[74].mxu1 }
 0x490   : > { %v2089_v9 = vadd.f32 %v2856_v7, %v3461_v27  ;;  %v2083_v10 = vpop.f32.mrb[75].mxu1 }
 0x491   : > { %v2084_v11 = vadd.f32 %v3461_v27, %v2083_v10 }
 0x492   : > { %2155 = vst [vmem:[%s3468_s27 + $0xb8] sm:$0xff] %v2089_v9 }
 0x493   : > { %2154 = vst [vmem:[%s3468_s27 + $0xb0] sm:$0xff] %v2084_v11  ;;  %v2859_v12 = vpop.f32.mrb[76].mxu1 }
 0x494   : > { %v2099_v13 = vadd.f32 %v2859_v12, %v3461_v27  ;;  %v2093_v14 = vpop.f32.mrb[77].mxu1 }
 0x495   : > { %v2094_v15 = vadd.f32 %v3461_v27, %v2093_v14 }
 0x496   : > { %2157 = vst [vmem:[%s3468_s27 + $0xc8] sm:$0xff] %v2099_v13 }
 0x497   : > { %2156 = vst [vmem:[%s3468_s27 + $0xc0] sm:$0xff] %v2094_v15  ;;  %v2862_v16 = vpop.f32.mrb[78].mxu1 }
 0x498   : > { %v2109_v17 = vadd.f32 %v2862_v16, %v3461_v27  ;;  %v2103_v18 = vpop.f32.mrb[79].mxu1 }
 0x499   : > { %v2104_v19 = vadd.f32 %v3461_v27, %v2103_v18 }
 0x49a   : > { %2159 = vst [vmem:[%s3468_s27 + $0xd8] sm:$0xff] %v2109_v17 }
 0x49b   : > { %2158 = vst [vmem:[%s3468_s27 + $0xd0] sm:$0xff] %v2104_v19  ;;  %v2865_v47 = vpop.f32.mrb[80].mxu1 }
 0x49c   : > { %v2119_v20 = vadd.f32 %v2865_v47, %v3461_v27  ;;  %v2113_v21 = vpop.f32.mrb[81].mxu1 }
 0x49d   : > { %v2114_v22 = vadd.f32 %v3461_v27, %v2113_v21 }
 0x49e   : > { %2161 = vst [vmem:[%s3468_s27 + $0xe8] sm:$0xff] %v2119_v20 }
 0x49f   : > { %2160 = vst [vmem:[%s3468_s27 + $0xe0] sm:$0xff] %v2114_v22  ;;  %v2868_v24 = vpop.f32.mrb[82].mxu1 }
 0x4a0   : > { %v2129_v25 = vadd.f32 %v2868_v24, %v3461_v27  ;;  %v2123_v26 = vpop.f32.mrb[83].mxu1 }
 0x4a1   : > { %v2124_v57 = vadd.f32 %v3461_v27, %v2123_v26 }
 0x4a2   : > { %2163 = vst [vmem:[%s3468_s27 + $0xf8] sm:$0xff] %v2129_v25 }
 0x4a3   : > { %2162 = vst [vmem:[%s3468_s27 + $0xf0] sm:$0xff] %v2124_v57 }
 0x4a4 PF: > { %s21_s17 = sadd.s32 1, %s2961_s17  }
 0x4a5   : > { %p18_p4 = scmp.ge.s32.totalorder %s21_s17, 4  }
 0x4a7   :  { %20 = sbr.rel (!%p18_p4) target bundleno = 1 (0x1), region = 94 }

</bundles_post_ra>
